<compile_context>
chip_gen: v6e
topology: v6e:2x2x1
jax: 0.10.0
libtpu: 0.0.40
codegen_flags: <defaults>
</compile_context>

<pallas_src>
import functools

import jax
import jax.numpy as jnp
from jax.experimental import pallas as pl
from jax.experimental.pallas import tpu as pltpu

_LANE = 128

# RGB -> XYZ matrix (constant from the module's __init__).
_M = (
    (0.412453, 0.35758, 0.180423),
    (0.212671, 0.71516, 0.072169),
    (0.019334, 0.119193, 0.950227),
)
_LAB_THRESH = 0.008856

# Fold (img + 1) * 0.5 and the per-row /sum(M_row) into one affine map:
#   xyz_n = sum_c _A[n][c] * raw_c + 0.5        (raw in [-1, 1])
_A = tuple(tuple(0.5 * m / sum(row) for m in row) for row in _M)

# VMEM sizing: budget for double-buffered inputs + live f32 temporaries,
# conservative enough to fit v7x (64 MiB VMEM, 32 MiB scoped limit).
_VMEM_BUDGET_BYTES = 22 * 1024 * 1024
_LIVE_F32_TEMPS = 22        # rough upper bound on live (B, T, 128) f32 temps


def _cdiv(a, b):
    return -(-a // b)


def _f_lab(t):
    # torch: pow(t, 1/3) where t > 0.008856 else 7.787*t + 0.137931
    # Cube root stays on the EUP (exp/log slot is free; the VALU is binding).
    t_safe = jnp.maximum(t, _LAB_THRESH)          # keep log() well-defined
    cbrt = jnp.exp(jnp.log(t_safe) * (1.0 / 3.0))
    return jnp.where(t > _LAB_THRESH, cbrt, 7.787 * t + 0.137931)


def _lab_features(c0, c1, c2):
    """Raw [-1, 1] RGB channels -> (L, fx, fy, fz), elementwise.

    A = 500*(fx - fy) and B = 200*(fy - fz) are linear in fx/fy/fz, so their
    masked averages are reconstructed from the fx/fy/fz sums in the wrapper
    (saves per-element subs/muls on the VALU-bound path).
    """
    x = _A[0][0] * c0 + _A[0][1] * c1 + _A[0][2] * c2 + 0.5
    y = _A[1][0] * c0 + _A[1][1] * c1 + _A[1][2] * c2 + 0.5
    z = _A[2][0] * c0 + _A[2][1] * c1 + _A[2][2] * c2 + 0.5
    fx = _f_lab(x)
    fz = _f_lab(z)
    y_gt = y > _LAB_THRESH                         # computed once, reused
    cbrt_y = jnp.exp(jnp.log(jnp.maximum(y, _LAB_THRESH)) * (1.0 / 3.0))
    fy = jnp.where(y_gt, cbrt_y, 7.787 * y + 0.137931)
    L = jnp.where(y_gt, 116.0 * fy - 16.0, 903.3 * y)
    return L, fx, fy, fz


def _partial_sums_kernel(fake_ref, real_ref, mf_ref, mr_ref, part_ref, *,
                         tiles_per_part, n_valid_tiles):
    """One spatial tile: accumulate lane-dense partial sums into part_ref.

    part_ref rows (each x 1 x 128 lanes), B = batch:
      [0 , B )  sum(L_fake *mf)   [4B, 5B)  sum(L_real *mr)
      [B , 2B)  sum(fx_fake*mf)   [5B, 6B)  sum(fx_real*mr)
      [2B, 3B)  sum(fy_fake*mf)   [6B, 7B)  sum(fy_real*mr)
      [3B, 4B)  sum(fz_fake*mf)   [7B, 8B)  sum(fz_real*mr)
      8B  sum(mf)   8B+1  sum(mr)   8B+2  sum(((fake-real)*bg)^2)
    """
    t = pl.program_id(1)

    @pl.when(t == 0)
    def _init():
        part_ref[...] = jnp.zeros_like(part_ref)

    def _accumulate():
        fake = fake_ref[...].astype(jnp.float32)       # (B, 3, T, 128)
        real = real_ref[...].astype(jnp.float32)
        mf = mf_ref[0].astype(jnp.float32)             # (T, 128)
        mr = mr_ref[0].astype(jnp.float32)

        f0, f1, f2 = fake[:, 0], fake[:, 1], fake[:, 2]    # (B, T, 128)
        r0, r1, r2 = real[:, 0], real[:, 1], real[:, 2]

        # Background MSE partial: ((fake-real) * (1 - (mf|mr)))**2 with a
        # single 0/1 multiply per pixel (bg mask shared across batch/channel).
        inv = jnp.where(jnp.logical_or(mf > 0.0, mr > 0.0), 0.0, 1.0)
        d0, d1, d2 = f0 - r0, f1 - r1, f2 - r2
        sq = jnp.sum(d0 * d0 + d1 * d1 + d2 * d2, axis=0)        # (T, 128)
        bg = jnp.sum(sq * inv, axis=0, keepdims=True)[None]      # (1, 1, 128)

        Lf, fxf, fyf, fzf = _lab_features(f0, f1, f2)
        Lr, fxr, fyr, fzr = _lab_features(r0, r1, r2)

        def msum(v, m):        # (B,T,128) x (T,128) -> (B,1,128): rows only,
            return jnp.sum(v * m[None], axis=1, keepdims=True)   # lanes kept

        tile_part = jnp.concatenate(
            [msum(Lf, mf), msum(fxf, mf), msum(fyf, mf), msum(fzf, mf),
             msum(Lr, mr), msum(fxr, mr), msum(fyr, mr), msum(fzr, mr),
             jnp.sum(mf, axis=0, keepdims=True)[None],
             jnp.sum(mr, axis=0, keepdims=True)[None],
             bg],
            axis=0)                                    # (8B + 3, 1, 128)
        part_ref[0] += tile_part

    if n_valid_tiles is None:
        _accumulate()
    else:
        # Ragged split of the tile range over the two core-partitions:
        # skip (DMA-clamped) tiles past the real tile count.
        g = pl.program_id(0) * tiles_per_part + t
        pl.when(g < n_valid_tiles)(_accumulate)


def _choose_tile_rows(rows, bytes_per_row):
    """Largest multiple-of-8 tile fitting the VMEM budget; prefer a tile that
    divides `rows` exactly so no wrapper-side padding copy is needed."""
    if rows <= 8:
        return rows
    cap = max(8, min(rows, _VMEM_BUDGET_BYTES // max(bytes_per_row, 1)))
    cap = max(8, cap - cap % 8)
    for t in range(cap, 7, -8):
        if rows % t == 0:
            return t
    return cap      # no aligned divisor: fall back to padding the row dim


def avg_lab_loss(fake, real, mask_fake, mask_real, *, tile_rows=None):
    """Returns (loss, lossb) matching AvgLabLoss.forward (hair masks given)."""
    fake = jnp.asarray(fake)
    real = jnp.asarray(real)
    assert fake.shape == real.shape
    B, C, H, W = fake.shape
    assert C == 3, "Lab conversion expects 3-channel images"
    hw = H * W

    # Keep images in their native floating dtype (bf16 stays bf16 -> half the
    # HBM traffic on v5e); the kernel upcasts per tile.
    if not jnp.issubdtype(fake.dtype, jnp.floating):
        fake = fake.astype(jnp.float32)
    if not jnp.issubdtype(real.dtype, jnp.floating):
        real = real.astype(jnp.float32)

    img_bytes = fake.dtype.itemsize + real.dtype.itemsize
    mask_bytes = 2 + 2          # masks travel as bf16 (binary {0,1} is exact)

    rows = _cdiv(hw, _LANE)
    # Per-row-of-128-pixels VMEM cost: double-buffered inputs + live temps.
    bytes_per_row = (2 * (B * 3 * _LANE * img_bytes + _LANE * mask_bytes)
                     + B * _LANE * 4 * _LIVE_F32_TEMPS)
    if tile_rows is None:
        T = _choose_tile_rows(rows, bytes_per_row)
    else:
        T = min(int(tile_rows), rows)
        if rows > 8:
            T = max(8, T - T % 8)

    rows_pad = _cdiv(rows, T) * T
    hw_pad = rows_pad * _LANE

    def prep_img(x):
        x = x.reshape(B, 3, hw)                      # free reshape
        if hw_pad != hw:
            # TODO(synk): lane/tile-aligned H*W avoids this full-copy pad.
            x = jnp.pad(x, ((0, 0), (0, 0), (0, hw_pad - hw)))
        return x.reshape(B, 3, rows_pad, _LANE)

    def prep_mask(m):
        m = jnp.asarray(m).reshape(1, hw).astype(jnp.bfloat16)
        if hw_pad != hw:
            m = jnp.pad(m, ((0, 0), (0, hw_pad - hw)))   # zero-pad the mask
        return m.reshape(1, rows_pad, _LANE)

    n_tiles = rows_pad // T
    parts = 2 if n_tiles >= 2 else 1        # use both TensorCores on v7x
    tpp = _cdiv(n_tiles, parts)             # tiles per core partition
    ragged = parts * tpp != n_tiles
    last_tile = n_tiles - 1

    def tile_index(c, t):
        g = c * tpp + t
        if ragged:
            g = jnp.minimum(g, last_tile)   # clamp: skipped in-kernel
        return g

    acc_rows = 8 * B + 3
    img_spec = pl.BlockSpec((B, 3, T, _LANE),
                            lambda c, t: (0, 0, tile_index(c, t), 0))
    mask_spec = pl.BlockSpec((1, T, _LANE),
                             lambda c, t: (0, tile_index(c, t), 0))
    out_spec = pl.BlockSpec((1, acc_rows, 1, _LANE),
                            lambda c, t: (c, 0, 0, 0))

    kernel = functools.partial(
        _partial_sums_kernel,
        tiles_per_part=tpp,
        n_valid_tiles=n_tiles if ragged else None)

    partials = pl.pallas_call(
        kernel,
        out_shape=jax.ShapeDtypeStruct((parts, acc_rows, 1, _LANE),
                                       jnp.float32),
        grid_spec=pltpu.PrefetchScalarGridSpec(
            num_scalar_prefetch=0,
            grid=(parts, tpp),
            in_specs=[img_spec, img_spec, mask_spec, mask_spec],
            out_specs=out_spec,
        ),
        compiler_params=pltpu.CompilerParams(
            dimension_semantics=("parallel", "arbitrary"),
            vmem_limit_bytes=32 * 1024 * 1024,
        ),
    )(prep_img(fake), prep_img(real), prep_mask(mask_fake),
      prep_mask(mask_real))

    # Trivial epilogue: combine per-core / per-lane partials and finish the
    # divides and means on 8B+3 scalars.
    tot = jnp.sum(partials, axis=(0, 2, 3))                  # (8B + 3,)
    msf = tot[8 * B]
    msr = tot[8 * B + 1]
    msf = jnp.where(msf == 0.0, 1.0, msf)                    # mask_sum[==0]=1
    msr = jnp.where(msr == 0.0, 1.0, msr)

    def lab_avgs(off, ms):
        s_l = tot[off:off + B]
        s_x = tot[off + B:off + 2 * B]
        s_y = tot[off + 2 * B:off + 3 * B]
        s_z = tot[off + 3 * B:off + 4 * B]
        return jnp.concatenate(
            [s_l, 500.0 * (s_x - s_y), 200.0 * (s_y - s_z)]) / ms

    avg_fake = lab_avgs(0, msf)                              # (3B,) L|A|B
    avg_real = lab_avgs(4 * B, msr)
    loss = jnp.mean(jnp.abs(avg_fake - avg_real))
    lossb = tot[8 * B + 2] * (1.0 / float(B * 3 * H * W))
    return loss, lossb


def _reference_avg_lab_loss(fake, real, mask_fake, mask_real):
    """Pure-JAX mirror of AvgLabLoss.forward (hair masks given) for checking."""
    M = jnp.asarray(_M, dtype=jnp.float32)
    fake = fake.astype(jnp.float32)
    real = real.astype(jnp.float32)
    mf = mask_fake.astype(jnp.float32)
    mr = mask_real.astype(jnp.float32)

    def rgb2xyz(img):
        rgb = (img + 1.0) / 2.0
        xyz = jnp.einsum('nc,bchw->bnhw', M, rgb)
        return xyz / jnp.sum(M, axis=1)[None, :, None, None]

    def f(t):
        return jnp.where(t > _LAB_THRESH, jnp.cbrt(t), 7.787 * t + 0.137931)

    def xyz2lab(xyz):
        xf = f(xyz)
        y = xyz[:, 1]
        L = jnp.where(y > _LAB_THRESH, 116.0 * xf[:, 1] - 16.0, 903.3 * y)
        A = 500.0 * (xf[:, 0] - xf[:, 1])
        Bc = 200.0 * (xf[:, 1] - xf[:, 2])
        return jnp.stack([L, A, Bc], axis=1)

    def hair_avg(lab, m):
        s = jnp.sum(lab * m[None, None], axis=(2, 3))
        ms = jnp.sum(m)
        ms = jnp.where(ms == 0.0, 1.0, ms)
        return s / ms

    fake_lab = xyz2lab(rgb2xyz(fake))
    real_lab = xyz2lab(rgb2xyz(real))
    loss = jnp.mean(jnp.abs(hair_avg(fake_lab, mf) - hair_avg(real_lab, mr)))
    bg = 1.0 - jnp.logical_or(mf > 0.0, mr > 0.0).astype(jnp.float32)
    lossb = jnp.mean(((fake - real) * bg[None, None]) ** 2)
    return loss, lossb


def _check(name, got, want, rtol=1e-3, atol=1e-4):
    ok = bool(jnp.abs(got - want) <= atol + rtol * jnp.abs(want))
    if not ok:
        raise AssertionError(f"{name}: got {got}, want {want}")


if __name__ == "__main__":
    key = jax.random.PRNGKey(0)
    k1, k2, k3, k4, k5, k6 = jax.random.split(key, 6)

    # Case 1/2: batch of 2, 64x64 images (32 lane-rows of 128 pixels).
    B, C, H, W = 2, 3, 64, 64
    fake = jax.random.uniform(k1, (B, C, H, W), jnp.float32,
                              minval=-1.0, maxval=1.0)
    real = jax.random.uniform(k2, (B, C, H, W), jnp.float32,
                              minval=-1.0, maxval=1.0)
    # Deterministic synthetic hair masks (stand-ins for parsenet output).
    mask_fake = (jax.random.uniform(k3, (H, W)) > 0.5).astype(jnp.float32)
    mask_real = (jax.random.uniform(k4, (H, W)) > 0.5).astype(jnp.float32)

    ref_loss, ref_lossb = _reference_avg_lab_loss(fake, real,
                                                  mask_fake, mask_real)

    # 1) Default (VMEM-budget derived) tiling: single tile, grid (1, 1).
    loss1, lossb1 = avg_lab_loss(fake, real, mask_fake, mask_real)
    # 2) Forced small tiles: grid (2, 2) exercises the megacore-parallel axis.
    loss2, lossb2 = avg_lab_loss(fake, real, mask_fake, mask_real, tile_rows=8)
    jax.block_until_ready((loss1, lossb1, loss2, lossb2))

    _check("loss(default)", loss1, ref_loss)
    _check("lossb(default)", lossb1, ref_lossb)
    _check("loss(tiled)", loss2, ref_loss)
    _check("lossb(tiled)", lossb2, ref_lossb)

    # 3) Odd tile count split over 2 partitions (ragged clamp path), B = 1.
    B3, H3, W3 = 1, 48, 64
    fake3 = jax.random.uniform(k5, (B3, 3, H3, W3), jnp.float32,
                               minval=-1.0, maxval=1.0)
    real3 = jax.random.uniform(k6, (B3, 3, H3, W3), jnp.float32,
                               minval=-1.0, maxval=1.0)
    mask3f = (jax.random.uniform(k3, (H3, W3)) > 0.5).astype(jnp.float32)
    mask3r = (jax.random.uniform(k4, (H3, W3)) > 0.5).astype(jnp.float32)
    ref3 = _reference_avg_lab_loss(fake3, real3, mask3f, mask3r)
    got3 = avg_lab_loss(fake3, real3, mask3f, mask3r, tile_rows=8)
    jax.block_until_ready(got3)
    _check("loss(ragged)", got3[0], ref3[0])
    _check("lossb(ragged)", got3[1], ref3[1])

    print("KERNEL_OK")
</pallas_src>

<mosaic_0001>
module attributes {stable_mosaic.version = 11 : i64} {
  func.func @_partial_sums_kernel(%arg0: i32, %arg1: i32, %arg2: memref<2x3x32x128xf32, #tpu.memory_space<vmem>>, %arg3: memref<2x3x32x128xf32, #tpu.memory_space<vmem>>, %arg4: memref<1x32x128xbf16, #tpu.memory_space<vmem>>, %arg5: memref<1x32x128xbf16, #tpu.memory_space<vmem>>, %arg6: memref<1x19x1x128xf32, #tpu.memory_space<vmem>>) attributes {dimension_semantics = [#tpu.dimension_semantics<parallel>, #tpu.dimension_semantics<arbitrary>], iteration_bounds = array<i64: 1, 1>, scalar_prefetch = 0 : i64, scratch_operands = 0 : i64, tpu.core_type = #tpu.core_type<tc>, window_params = [{transform_indices = @transform_0, window_bounds = array<i64: 2, 3, 32, 128>}, {transform_indices = @transform_1, window_bounds = array<i64: 2, 3, 32, 128>}, {transform_indices = @transform_2, window_bounds = array<i64: 1, 32, 128>}, {transform_indices = @transform_3, window_bounds = array<i64: 1, 32, 128>}, {transform_indices = @transform_4, window_bounds = array<i64: 1, 19, 1, 128>}]} {
    %c0_i32 = arith.constant 0 : i32
    %0 = arith.cmpi eq, %arg1, %c0_i32 : i32
    %1 = arith.extui %0 : i1 to i32
    %c0_i32_0 = arith.constant 0 : i32
    %2 = arith.cmpi ne, %1, %c0_i32_0 : i32
    scf.if %2 {
      %cst_97 = arith.constant 0.000000e+00 : f32
      %249 = vector.broadcast %cst_97 : f32 to vector<1x19x1x128xf32>
      %c0_98 = arith.constant 0 : index
      %c0_99 = arith.constant 0 : index
      %c0_100 = arith.constant 0 : index
      %c0_101 = arith.constant 0 : index
      %250 = vector.load %arg6[%c0_98, %c0_99, %c0_100, %c0_101] : memref<1x19x1x128xf32, #tpu.memory_space<vmem>>, vector<1x19x1x128xf32>
      tpu.vector_store %arg6[%c0_98, %c0_99, %c0_100, %c0_101], %249 {strides = array<i32>} : memref<1x19x1x128xf32, #tpu.memory_space<vmem>>, vector<1x19x1x128xf32>,
    } else {
    }
    %c0 = arith.constant 0 : index
    %c0_1 = arith.constant 0 : index
    %c0_2 = arith.constant 0 : index
    %c0_3 = arith.constant 0 : index
    %3 = vector.load %arg2[%c0, %c0_1, %c0_2, %c0_3] : memref<2x3x32x128xf32, #tpu.memory_space<vmem>>, vector<2x3x32x128xf32>
    %c0_4 = arith.constant 0 : index
    %c0_5 = arith.constant 0 : index
    %c0_6 = arith.constant 0 : index
    %c0_7 = arith.constant 0 : index
    %4 = vector.load %arg3[%c0_4, %c0_5, %c0_6, %c0_7] : memref<2x3x32x128xf32, #tpu.memory_space<vmem>>, vector<2x3x32x128xf32>
    %c0_8 = arith.constant 0 : index
    %c0_9 = arith.constant 0 : index
    %c0_10 = arith.constant 0 : index
    %5 = vector.load %arg4[%c0_8, %c0_9, %c0_10] : memref<1x32x128xbf16, #tpu.memory_space<vmem>>, vector<1x32x128xbf16>
    %6 = vector.shape_cast %5 : vector<1x32x128xbf16> to vector<32x128xbf16>
    %7 = arith.extf %6 : vector<32x128xbf16> to vector<32x128xf32>
    %c0_11 = arith.constant 0 : index
    %c0_12 = arith.constant 0 : index
    %c0_13 = arith.constant 0 : index
    %8 = vector.load %arg5[%c0_11, %c0_12, %c0_13] : memref<1x32x128xbf16, #tpu.memory_space<vmem>>, vector<1x32x128xbf16>
    %9 = vector.shape_cast %8 : vector<1x32x128xbf16> to vector<32x128xbf16>
    %10 = arith.extf %9 : vector<32x128xbf16> to vector<32x128xf32>
    %11 = vector.extract_strided_slice %3 {offsets = [0, 0, 0, 0], sizes = [2, 1, 32, 128], strides = [1, 1, 1, 1]} : vector<2x3x32x128xf32> to vector<2x1x32x128xf32>
    %12 = vector.shape_cast %11 : vector<2x1x32x128xf32> to vector<2x32x128xf32>
    %13 = vector.extract_strided_slice %3 {offsets = [0, 1, 0, 0], sizes = [2, 1, 32, 128], strides = [1, 1, 1, 1]} : vector<2x3x32x128xf32> to vector<2x1x32x128xf32>
    %14 = vector.shape_cast %13 : vector<2x1x32x128xf32> to vector<2x32x128xf32>
    %15 = vector.extract_strided_slice %3 {offsets = [0, 2, 0, 0], sizes = [2, 1, 32, 128], strides = [1, 1, 1, 1]} : vector<2x3x32x128xf32> to vector<2x1x32x128xf32>
    %16 = vector.shape_cast %15 : vector<2x1x32x128xf32> to vector<2x32x128xf32>
    %17 = vector.extract_strided_slice %4 {offsets = [0, 0, 0, 0], sizes = [2, 1, 32, 128], strides = [1, 1, 1, 1]} : vector<2x3x32x128xf32> to vector<2x1x32x128xf32>
    %18 = vector.shape_cast %17 : vector<2x1x32x128xf32> to vector<2x32x128xf32>
    %19 = vector.extract_strided_slice %4 {offsets = [0, 1, 0, 0], sizes = [2, 1, 32, 128], strides = [1, 1, 1, 1]} : vector<2x3x32x128xf32> to vector<2x1x32x128xf32>
    %20 = vector.shape_cast %19 : vector<2x1x32x128xf32> to vector<2x32x128xf32>
    %21 = vector.extract_strided_slice %4 {offsets = [0, 2, 0, 0], sizes = [2, 1, 32, 128], strides = [1, 1, 1, 1]} : vector<2x3x32x128xf32> to vector<2x1x32x128xf32>
    %22 = vector.shape_cast %21 : vector<2x1x32x128xf32> to vector<2x32x128xf32>
    %cst = arith.constant 0.000000e+00 : f32
    %23 = vector.broadcast %cst : f32 to vector<32x128xf32>
    %24 = arith.cmpf ogt, %7, %23 : vector<32x128xf32>
    %cst_14 = arith.constant 0.000000e+00 : f32
    %25 = vector.broadcast %cst_14 : f32 to vector<32x128xf32>
    %26 = arith.cmpf ogt, %10, %25 : vector<32x128xf32>
    %27 = arith.ori %24, %26 : vector<32x128xi1>
    %cst_15 = arith.constant 0.000000e+00 : f32
    %cst_16 = arith.constant 1.000000e+00 : f32
    %28 = vector.broadcast %cst_15 : f32 to vector<32x128xf32>
    %29 = vector.broadcast %cst_16 : f32 to vector<32x128xf32>
    %30 = arith.select %27, %28, %29 : vector<32x128xi1>, vector<32x128xf32>
    %31 = arith.subf %12, %18 : vector<2x32x128xf32>
    %32 = arith.subf %14, %20 : vector<2x32x128xf32>
    %33 = arith.subf %16, %22 : vector<2x32x128xf32>
    %34 = arith.mulf %31, %31 : vector<2x32x128xf32>
    %35 = arith.mulf %32, %32 : vector<2x32x128xf32>
    %36 = arith.addf %34, %35 : vector<2x32x128xf32>
    %37 = arith.mulf %33, %33 : vector<2x32x128xf32>
    %38 = arith.addf %36, %37 : vector<2x32x128xf32>
    %cst_17 = arith.constant dense<0.000000e+00> : vector<32x128xf32>
    %39 = vector.multi_reduction <add>, %38, %cst_17 [0] : vector<2x32x128xf32> to vector<32x128xf32>
    %40 = arith.mulf %39, %30 : vector<32x128xf32>
    %cst_18 = arith.constant dense<0.000000e+00> : vector<128xf32>
    %41 = vector.multi_reduction <add>, %40, %cst_18 [0] : vector<32x128xf32> to vector<128xf32>
    %42 = vector.shape_cast %41 : vector<128xf32> to vector<1x128xf32>
    %43 = vector.shape_cast %42 : vector<1x128xf32> to vector<1x1x128xf32>
    %cst_19 = arith.constant 0.216976374 : f32
    %44 = vector.broadcast %cst_19 : f32 to vector<2x32x128xf32>
    %45 = arith.mulf %44, %12 : vector<2x32x128xf32>
    %cst_20 = arith.constant 0.188109711 : f32
    %46 = vector.broadcast %cst_20 : f32 to vector<2x32x128xf32>
    %47 = arith.mulf %46, %14 : vector<2x32x128xf32>
    %48 = arith.addf %45, %47 : vector<2x32x128xf32>
    %cst_21 = arith.constant 0.0949139148 : f32
    %49 = vector.broadcast %cst_21 : f32 to vector<2x32x128xf32>
    %50 = arith.mulf %49, %16 : vector<2x32x128xf32>
    %51 = arith.addf %48, %50 : vector<2x32x128xf32>
    %cst_22 = arith.constant 5.000000e-01 : f32
    %52 = vector.broadcast %cst_22 : f32 to vector<2x32x128xf32>
    %53 = arith.addf %51, %52 : vector<2x32x128xf32>
    %cst_23 = arith.constant 0.106335498 : f32
    %54 = vector.broadcast %cst_23 : f32 to vector<2x32x128xf32>
    %55 = arith.mulf %54, %12 : vector<2x32x128xf32>
    %cst_24 = arith.constant 3.575800e-01 : f32
    %56 = vector.broadcast %cst_24 : f32 to vector<2x32x128xf32>
    %57 = arith.mulf %56, %14 : vector<2x32x128xf32>
    %58 = arith.addf %55, %57 : vector<2x32x128xf32>
    %cst_25 = arith.constant 3.608450e-02 : f32
    %59 = vector.broadcast %cst_25 : f32 to vector<2x32x128xf32>
    %60 = arith.mulf %59, %16 : vector<2x32x128xf32>
    %61 = arith.addf %58, %60 : vector<2x32x128xf32>
    %cst_26 = arith.constant 5.000000e-01 : f32
    %62 = vector.broadcast %cst_26 : f32 to vector<2x32x128xf32>
    %63 = arith.addf %61, %62 : vector<2x32x128xf32>
    %cst_27 = arith.constant 0.00887895748 : f32
    %64 = vector.broadcast %cst_27 : f32 to vector<2x32x128xf32>
    %65 = arith.mulf %64, %12 : vector<2x32x128xf32>
    %cst_28 = arith.constant 0.0547382608 : f32
    %66 = vector.broadcast %cst_28 : f32 to vector<2x32x128xf32>
    %67 = arith.mulf %66, %14 : vector<2x32x128xf32>
    %68 = arith.addf %65, %67 : vector<2x32x128xf32>
    %cst_29 = arith.constant 0.436382771 : f32
    %69 = vector.broadcast %cst_29 : f32 to vector<2x32x128xf32>
    %70 = arith.mulf %69, %16 : vector<2x32x128xf32>
    %71 = arith.addf %68, %70 : vector<2x32x128xf32>
    %cst_30 = arith.constant 5.000000e-01 : f32
    %72 = vector.broadcast %cst_30 : f32 to vector<2x32x128xf32>
    %73 = arith.addf %71, %72 : vector<2x32x128xf32>
    %cst_31 = arith.constant 8.856000e-03 : f32
    %74 = vector.broadcast %cst_31 : f32 to vector<2x32x128xf32>
    %75 = arith.maximumf %53, %74 : vector<2x32x128xf32>
    %76 = math.log %75 : vector<2x32x128xf32>
    %cst_32 = arith.constant 0.333333343 : f32
    %77 = vector.broadcast %cst_32 : f32 to vector<2x32x128xf32>
    %78 = arith.mulf %76, %77 : vector<2x32x128xf32>
    %79 = math.exp %78 : vector<2x32x128xf32>
    %cst_33 = arith.constant 8.856000e-03 : f32
    %80 = vector.broadcast %cst_33 : f32 to vector<2x32x128xf32>
    %81 = arith.cmpf ogt, %53, %80 : vector<2x32x128xf32>
    %cst_34 = arith.constant 7.787000e+00 : f32
    %82 = vector.broadcast %cst_34 : f32 to vector<2x32x128xf32>
    %83 = arith.mulf %82, %53 : vector<2x32x128xf32>
    %cst_35 = arith.constant 1.379310e-01 : f32
    %84 = vector.broadcast %cst_35 : f32 to vector<2x32x128xf32>
    %85 = arith.addf %83, %84 : vector<2x32x128xf32>
    %86 = arith.select %81, %79, %85 : vector<2x32x128xi1>, vector<2x32x128xf32>
    %cst_36 = arith.constant 8.856000e-03 : f32
    %87 = vector.broadcast %cst_36 : f32 to vector<2x32x128xf32>
    %88 = arith.maximumf %73, %87 : vector<2x32x128xf32>
    %89 = math.log %88 : vector<2x32x128xf32>
    %cst_37 = arith.constant 0.333333343 : f32
    %90 = vector.broadcast %cst_37 : f32 to vector<2x32x128xf32>
    %91 = arith.mulf %89, %90 : vector<2x32x128xf32>
    %92 = math.exp %91 : vector<2x32x128xf32>
    %cst_38 = arith.constant 8.856000e-03 : f32
    %93 = vector.broadcast %cst_38 : f32 to vector<2x32x128xf32>
    %94 = arith.cmpf ogt, %73, %93 : vector<2x32x128xf32>
    %cst_39 = arith.constant 7.787000e+00 : f32
    %95 = vector.broadcast %cst_39 : f32 to vector<2x32x128xf32>
    %96 = arith.mulf %95, %73 : vector<2x32x128xf32>
    %cst_40 = arith.constant 1.379310e-01 : f32
    %97 = vector.broadcast %cst_40 : f32 to vector<2x32x128xf32>
    %98 = arith.addf %96, %97 : vector<2x32x128xf32>
    %99 = arith.select %94, %92, %98 : vector<2x32x128xi1>, vector<2x32x128xf32>
    %cst_41 = arith.constant 8.856000e-03 : f32
    %100 = vector.broadcast %cst_41 : f32 to vector<2x32x128xf32>
    %101 = arith.cmpf ogt, %63, %100 : vector<2x32x128xf32>
    %cst_42 = arith.constant 8.856000e-03 : f32
    %102 = vector.broadcast %cst_42 : f32 to vector<2x32x128xf32>
    %103 = arith.maximumf %63, %102 : vector<2x32x128xf32>
    %104 = math.log %103 : vector<2x32x128xf32>
    %cst_43 = arith.constant 0.333333343 : f32
    %105 = vector.broadcast %cst_43 : f32 to vector<2x32x128xf32>
    %106 = arith.mulf %104, %105 : vector<2x32x128xf32>
    %107 = math.exp %106 : vector<2x32x128xf32>
    %cst_44 = arith.constant 7.787000e+00 : f32
    %108 = vector.broadcast %cst_44 : f32 to vector<2x32x128xf32>
    %109 = arith.mulf %108, %63 : vector<2x32x128xf32>
    %cst_45 = arith.constant 1.379310e-01 : f32
    %110 = vector.broadcast %cst_45 : f32 to vector<2x32x128xf32>
    %111 = arith.addf %109, %110 : vector<2x32x128xf32>
    %112 = arith.select %101, %107, %111 : vector<2x32x128xi1>, vector<2x32x128xf32>
    %cst_46 = arith.constant 1.160000e+02 : f32
    %113 = vector.broadcast %cst_46 : f32 to vector<2x32x128xf32>
    %114 = arith.mulf %113, %112 : vector<2x32x128xf32>
    %cst_47 = arith.constant 1.600000e+01 : f32
    %115 = vector.broadcast %cst_47 : f32 to vector<2x32x128xf32>
    %116 = arith.subf %114, %115 : vector<2x32x128xf32>
    %cst_48 = arith.constant 903.299987 : f32
    %117 = vector.broadcast %cst_48 : f32 to vector<2x32x128xf32>
    %118 = arith.mulf %117, %63 : vector<2x32x128xf32>
    %119 = arith.select %101, %116, %118 : vector<2x32x128xi1>, vector<2x32x128xf32>
    %cst_49 = arith.constant 0.216976374 : f32
    %120 = vector.broadcast %cst_49 : f32 to vector<2x32x128xf32>
    %121 = arith.mulf %120, %18 : vector<2x32x128xf32>
    %cst_50 = arith.constant 0.188109711 : f32
    %122 = vector.broadcast %cst_50 : f32 to vector<2x32x128xf32>
    %123 = arith.mulf %122, %20 : vector<2x32x128xf32>
    %124 = arith.addf %121, %123 : vector<2x32x128xf32>
    %cst_51 = arith.constant 0.0949139148 : f32
    %125 = vector.broadcast %cst_51 : f32 to vector<2x32x128xf32>
    %126 = arith.mulf %125, %22 : vector<2x32x128xf32>
    %127 = arith.addf %124, %126 : vector<2x32x128xf32>
    %cst_52 = arith.constant 5.000000e-01 : f32
    %128 = vector.broadcast %cst_52 : f32 to vector<2x32x128xf32>
    %129 = arith.addf %127, %128 : vector<2x32x128xf32>
    %cst_53 = arith.constant 0.106335498 : f32
    %130 = vector.broadcast %cst_53 : f32 to vector<2x32x128xf32>
    %131 = arith.mulf %130, %18 : vector<2x32x128xf32>
    %cst_54 = arith.constant 3.575800e-01 : f32
    %132 = vector.broadcast %cst_54 : f32 to vector<2x32x128xf32>
    %133 = arith.mulf %132, %20 : vector<2x32x128xf32>
    %134 = arith.addf %131, %133 : vector<2x32x128xf32>
    %cst_55 = arith.constant 3.608450e-02 : f32
    %135 = vector.broadcast %cst_55 : f32 to vector<2x32x128xf32>
    %136 = arith.mulf %135, %22 : vector<2x32x128xf32>
    %137 = arith.addf %134, %136 : vector<2x32x128xf32>
    %cst_56 = arith.constant 5.000000e-01 : f32
    %138 = vector.broadcast %cst_56 : f32 to vector<2x32x128xf32>
    %139 = arith.addf %137, %138 : vector<2x32x128xf32>
    %cst_57 = arith.constant 0.00887895748 : f32
    %140 = vector.broadcast %cst_57 : f32 to vector<2x32x128xf32>
    %141 = arith.mulf %140, %18 : vector<2x32x128xf32>
    %cst_58 = arith.constant 0.0547382608 : f32
    %142 = vector.broadcast %cst_58 : f32 to vector<2x32x128xf32>
    %143 = arith.mulf %142, %20 : vector<2x32x128xf32>
    %144 = arith.addf %141, %143 : vector<2x32x128xf32>
    %cst_59 = arith.constant 0.436382771 : f32
    %145 = vector.broadcast %cst_59 : f32 to vector<2x32x128xf32>
    %146 = arith.mulf %145, %22 : vector<2x32x128xf32>
    %147 = arith.addf %144, %146 : vector<2x32x128xf32>
    %cst_60 = arith.constant 5.000000e-01 : f32
    %148 = vector.broadcast %cst_60 : f32 to vector<2x32x128xf32>
    %149 = arith.addf %147, %148 : vector<2x32x128xf32>
    %cst_61 = arith.constant 8.856000e-03 : f32
    %150 = vector.broadcast %cst_61 : f32 to vector<2x32x128xf32>
    %151 = arith.maximumf %129, %150 : vector<2x32x128xf32>
    %152 = math.log %151 : vector<2x32x128xf32>
    %cst_62 = arith.constant 0.333333343 : f32
    %153 = vector.broadcast %cst_62 : f32 to vector<2x32x128xf32>
    %154 = arith.mulf %152, %153 : vector<2x32x128xf32>
    %155 = math.exp %154 : vector<2x32x128xf32>
    %cst_63 = arith.constant 8.856000e-03 : f32
    %156 = vector.broadcast %cst_63 : f32 to vector<2x32x128xf32>
    %157 = arith.cmpf ogt, %129, %156 : vector<2x32x128xf32>
    %cst_64 = arith.constant 7.787000e+00 : f32
    %158 = vector.broadcast %cst_64 : f32 to vector<2x32x128xf32>
    %159 = arith.mulf %158, %129 : vector<2x32x128xf32>
    %cst_65 = arith.constant 1.379310e-01 : f32
    %160 = vector.broadcast %cst_65 : f32 to vector<2x32x128xf32>
    %161 = arith.addf %159, %160 : vector<2x32x128xf32>
    %162 = arith.select %157, %155, %161 : vector<2x32x128xi1>, vector<2x32x128xf32>
    %cst_66 = arith.constant 8.856000e-03 : f32
    %163 = vector.broadcast %cst_66 : f32 to vector<2x32x128xf32>
    %164 = arith.maximumf %149, %163 : vector<2x32x128xf32>
    %165 = math.log %164 : vector<2x32x128xf32>
    %cst_67 = arith.constant 0.333333343 : f32
    %166 = vector.broadcast %cst_67 : f32 to vector<2x32x128xf32>
    %167 = arith.mulf %165, %166 : vector<2x32x128xf32>
    %168 = math.exp %167 : vector<2x32x128xf32>
    %cst_68 = arith.constant 8.856000e-03 : f32
    %169 = vector.broadcast %cst_68 : f32 to vector<2x32x128xf32>
    %170 = arith.cmpf ogt, %149, %169 : vector<2x32x128xf32>
    %cst_69 = arith.constant 7.787000e+00 : f32
    %171 = vector.broadcast %cst_69 : f32 to vector<2x32x128xf32>
    %172 = arith.mulf %171, %149 : vector<2x32x128xf32>
    %cst_70 = arith.constant 1.379310e-01 : f32
    %173 = vector.broadcast %cst_70 : f32 to vector<2x32x128xf32>
    %174 = arith.addf %172, %173 : vector<2x32x128xf32>
    %175 = arith.select %170, %168, %174 : vector<2x32x128xi1>, vector<2x32x128xf32>
    %cst_71 = arith.constant 8.856000e-03 : f32
    %176 = vector.broadcast %cst_71 : f32 to vector<2x32x128xf32>
    %177 = arith.cmpf ogt, %139, %176 : vector<2x32x128xf32>
    %cst_72 = arith.constant 8.856000e-03 : f32
    %178 = vector.broadcast %cst_72 : f32 to vector<2x32x128xf32>
    %179 = arith.maximumf %139, %178 : vector<2x32x128xf32>
    %180 = math.log %179 : vector<2x32x128xf32>
    %cst_73 = arith.constant 0.333333343 : f32
    %181 = vector.broadcast %cst_73 : f32 to vector<2x32x128xf32>
    %182 = arith.mulf %180, %181 : vector<2x32x128xf32>
    %183 = math.exp %182 : vector<2x32x128xf32>
    %cst_74 = arith.constant 7.787000e+00 : f32
    %184 = vector.broadcast %cst_74 : f32 to vector<2x32x128xf32>
    %185 = arith.mulf %184, %139 : vector<2x32x128xf32>
    %cst_75 = arith.constant 1.379310e-01 : f32
    %186 = vector.broadcast %cst_75 : f32 to vector<2x32x128xf32>
    %187 = arith.addf %185, %186 : vector<2x32x128xf32>
    %188 = arith.select %177, %183, %187 : vector<2x32x128xi1>, vector<2x32x128xf32>
    %cst_76 = arith.constant 1.160000e+02 : f32
    %189 = vector.broadcast %cst_76 : f32 to vector<2x32x128xf32>
    %190 = arith.mulf %189, %188 : vector<2x32x128xf32>
    %cst_77 = arith.constant 1.600000e+01 : f32
    %191 = vector.broadcast %cst_77 : f32 to vector<2x32x128xf32>
    %192 = arith.subf %190, %191 : vector<2x32x128xf32>
    %cst_78 = arith.constant 903.299987 : f32
    %193 = vector.broadcast %cst_78 : f32 to vector<2x32x128xf32>
    %194 = arith.mulf %193, %139 : vector<2x32x128xf32>
    %195 = arith.select %177, %192, %194 : vector<2x32x128xi1>, vector<2x32x128xf32>
    %196 = vector.shape_cast %7 : vector<32x128xf32> to vector<1x32x128xf32>
    %197 = vector.broadcast %196 : vector<1x32x128xf32> to vector<2x32x128xf32>
    %198 = arith.mulf %119, %197 : vector<2x32x128xf32>
    %cst_79 = arith.constant dense<0.000000e+00> : vector<2x128xf32>
    %199 = vector.multi_reduction <add>, %198, %cst_79 [1] : vector<2x32x128xf32> to vector<2x128xf32>
    %200 = vector.shape_cast %199 : vector<2x128xf32> to vector<2x1x128xf32>
    %201 = vector.shape_cast %7 : vector<32x128xf32> to vector<1x32x128xf32>
    %202 = vector.broadcast %201 : vector<1x32x128xf32> to vector<2x32x128xf32>
    %203 = arith.mulf %86, %202 : vector<2x32x128xf32>
    %cst_80 = arith.constant dense<0.000000e+00> : vector<2x128xf32>
    %204 = vector.multi_reduction <add>, %203, %cst_80 [1] : vector<2x32x128xf32> to vector<2x128xf32>
    %205 = vector.shape_cast %204 : vector<2x128xf32> to vector<2x1x128xf32>
    %206 = vector.shape_cast %7 : vector<32x128xf32> to vector<1x32x128xf32>
    %207 = vector.broadcast %206 : vector<1x32x128xf32> to vector<2x32x128xf32>
    %208 = arith.mulf %112, %207 : vector<2x32x128xf32>
    %cst_81 = arith.constant dense<0.000000e+00> : vector<2x128xf32>
    %209 = vector.multi_reduction <add>, %208, %cst_81 [1] : vector<2x32x128xf32> to vector<2x128xf32>
    %210 = vector.shape_cast %209 : vector<2x128xf32> to vector<2x1x128xf32>
    %211 = vector.shape_cast %7 : vector<32x128xf32> to vector<1x32x128xf32>
    %212 = vector.broadcast %211 : vector<1x32x128xf32> to vector<2x32x128xf32>
    %213 = arith.mulf %99, %212 : vector<2x32x128xf32>
    %cst_82 = arith.constant dense<0.000000e+00> : vector<2x128xf32>
    %214 = vector.multi_reduction <add>, %213, %cst_82 [1] : vector<2x32x128xf32> to vector<2x128xf32>
    %215 = vector.shape_cast %214 : vector<2x128xf32> to vector<2x1x128xf32>
    %216 = vector.shape_cast %10 : vector<32x128xf32> to vector<1x32x128xf32>
    %217 = vector.broadcast %216 : vector<1x32x128xf32> to vector<2x32x128xf32>
    %218 = arith.mulf %195, %217 : vector<2x32x128xf32>
    %cst_83 = arith.constant dense<0.000000e+00> : vector<2x128xf32>
    %219 = vector.multi_reduction <add>, %218, %cst_83 [1] : vector<2x32x128xf32> to vector<2x128xf32>
    %220 = vector.shape_cast %219 : vector<2x128xf32> to vector<2x1x128xf32>
    %221 = vector.shape_cast %10 : vector<32x128xf32> to vector<1x32x128xf32>
    %222 = vector.broadcast %221 : vector<1x32x128xf32> to vector<2x32x128xf32>
    %223 = arith.mulf %162, %222 : vector<2x32x128xf32>
    %cst_84 = arith.constant dense<0.000000e+00> : vector<2x128xf32>
    %224 = vector.multi_reduction <add>, %223, %cst_84 [1] : vector<2x32x128xf32> to vector<2x128xf32>
    %225 = vector.shape_cast %224 : vector<2x128xf32> to vector<2x1x128xf32>
    %226 = vector.shape_cast %10 : vector<32x128xf32> to vector<1x32x128xf32>
    %227 = vector.broadcast %226 : vector<1x32x128xf32> to vector<2x32x128xf32>
    %228 = arith.mulf %188, %227 : vector<2x32x128xf32>
    %cst_85 = arith.constant dense<0.000000e+00> : vector<2x128xf32>
    %229 = vector.multi_reduction <add>, %228, %cst_85 [1] : vector<2x32x128xf32> to vector<2x128xf32>
    %230 = vector.shape_cast %229 : vector<2x128xf32> to vector<2x1x128xf32>
    %231 = vector.shape_cast %10 : vector<32x128xf32> to vector<1x32x128xf32>
    %232 = vector.broadcast %231 : vector<1x32x128xf32> to vector<2x32x128xf32>
    %233 = arith.mulf %175, %232 : vector<2x32x128xf32>
    %cst_86 = arith.constant dense<0.000000e+00> : vector<2x128xf32>
    %234 = vector.multi_reduction <add>, %233, %cst_86 [1] : vector<2x32x128xf32> to vector<2x128xf32>
    %235 = vector.shape_cast %234 : vector<2x128xf32> to vector<2x1x128xf32>
    %cst_87 = arith.constant dense<0.000000e+00> : vector<128xf32>
    %236 = vector.multi_reduction <add>, %7, %cst_87 [0] : vector<32x128xf32> to vector<128xf32>
    %237 = vector.shape_cast %236 : vector<128xf32> to vector<1x128xf32>
    %238 = vector.shape_cast %237 : vector<1x128xf32> to vector<1x1x128xf32>
    %cst_88 = arith.constant dense<0.000000e+00> : vector<128xf32>
    %239 = vector.multi_reduction <add>, %10, %cst_88 [0] : vector<32x128xf32> to vector<128xf32>
    %240 = vector.shape_cast %239 : vector<128xf32> to vector<1x128xf32>
    %241 = vector.shape_cast %240 : vector<1x128xf32> to vector<1x1x128xf32>
    %242 = tpu.concatenate %200, %205, %210, %215, %220, %225, %230, %235, %238, %241, %43 in 0 : vector<2x1x128xf32>, vector<2x1x128xf32>, vector<2x1x128xf32>, vector<2x1x128xf32>, vector<2x1x128xf32>, vector<2x1x128xf32>, vector<2x1x128xf32>, vector<2x1x128xf32>, vector<1x1x128xf32>, vector<1x1x128xf32>, vector<1x1x128xf32> -> vector<19x1x128xf32>
    %c0_89 = arith.constant 0 : index
    %c0_90 = arith.constant 0 : index
    %c0_91 = arith.constant 0 : index
    %c0_92 = arith.constant 0 : index
    %243 = vector.load %arg6[%c0_89, %c0_90, %c0_91, %c0_92] : memref<1x19x1x128xf32, #tpu.memory_space<vmem>>, vector<1x19x1x128xf32>
    %244 = vector.shape_cast %243 : vector<1x19x1x128xf32> to vector<19x1x128xf32>
    %245 = arith.addf %244, %242 : vector<19x1x128xf32>
    %c0_93 = arith.constant 0 : index
    %c0_94 = arith.constant 0 : index
    %c0_95 = arith.constant 0 : index
    %c0_96 = arith.constant 0 : index
    %246 = vector.load %arg6[%c0_93, %c0_94, %c0_95, %c0_96] : memref<1x19x1x128xf32, #tpu.memory_space<vmem>>, vector<1x19x1x128xf32>
    %247 = vector.shape_cast %246 : vector<1x19x1x128xf32> to vector<19x1x128xf32>
    %248 = vector.shape_cast %245 : vector<19x1x128xf32> to vector<1x19x1x128xf32>
    tpu.vector_store %arg6[%c0_93, %c0_94, %c0_95, %c0_96], %248 {strides = array<i32>} : memref<1x19x1x128xf32, #tpu.memory_space<vmem>>, vector<1x19x1x128xf32>,
    return
  }
  func.func @transform_0(%arg0: i32, %arg1: i32) -> (i32, i32, i32, i32) {
    %c1_i32 = arith.constant 1 : i32
    %0 = arith.muli %arg0, %c1_i32 : i32
    %1 = arith.addi %0, %arg1 : i32
    %c0_i32 = arith.constant 0 : i32
    %c0_i32_0 = arith.constant 0 : i32
    %c0_i32_1 = arith.constant 0 : i32
    %c0_i32_2 = arith.constant 0 : i32
    return %c0_i32, %c0_i32_0, %1, %c0_i32_1 : i32, i32, i32, i32
  }
  func.func @transform_1(%arg0: i32, %arg1: i32) -> (i32, i32, i32, i32) {
    %c1_i32 = arith.constant 1 : i32
    %0 = arith.muli %arg0, %c1_i32 : i32
    %1 = arith.addi %0, %arg1 : i32
    %c0_i32 = arith.constant 0 : i32
    %c0_i32_0 = arith.constant 0 : i32
    %c0_i32_1 = arith.constant 0 : i32
    %c0_i32_2 = arith.constant 0 : i32
    return %c0_i32, %c0_i32_0, %1, %c0_i32_1 : i32, i32, i32, i32
  }
  func.func @transform_2(%arg0: i32, %arg1: i32) -> (i32, i32, i32) {
    %c1_i32 = arith.constant 1 : i32
    %0 = arith.muli %arg0, %c1_i32 : i32
    %1 = arith.addi %0, %arg1 : i32
    %c0_i32 = arith.constant 0 : i32
    %c0_i32_0 = arith.constant 0 : i32
    %c0_i32_1 = arith.constant 0 : i32
    return %c0_i32, %1, %c0_i32_0 : i32, i32, i32
  }
  func.func @transform_3(%arg0: i32, %arg1: i32) -> (i32, i32, i32) {
    %c1_i32 = arith.constant 1 : i32
    %0 = arith.muli %arg0, %c1_i32 : i32
    %1 = arith.addi %0, %arg1 : i32
    %c0_i32 = arith.constant 0 : i32
    %c0_i32_0 = arith.constant 0 : i32
    %c0_i32_1 = arith.constant 0 : i32
    return %c0_i32, %1, %c0_i32_0 : i32, i32, i32
  }
  func.func @transform_4(%arg0: i32, %arg1: i32) -> (i32, i32, i32, i32) {
    %c0_i32 = arith.constant 0 : i32
    %c0_i32_0 = arith.constant 0 : i32
    %c0_i32_1 = arith.constant 0 : i32
    %c0_i32_2 = arith.constant 0 : i32
    return %arg0, %c0_i32, %c0_i32_0, %c0_i32_1 : i32, i32, i32, i32
  }
}

</mosaic_0001>

<bundles_post_ra>
// kernel: tpu_custom_call.1
= control target key start
LH: loop header
LB: loop body
LE: loop exit
PB: predicated region body
PF: predicated region fallthrough
CT: control target
= control target key end

     0   :  { %9 = vsyncpa [#allocation3], 0  ;;  %s2862_s0 = inlined_call_operand.hbm [shape: f32[2,3,32,128], index: 0, kind: input, shape index: {}]   ;;  %s2863_s1 = inlined_call_operand.hbm [shape: f32[2,3,32,128], index: 1, kind: input, shape index: {}]   ;;  %s2864_s2 = inlined_call_operand.hbm [shape: bf16[1,32,128], index: 2, kind: input, shape index: {}]   ;;  %s2865_s3 = inlined_call_operand.hbm [shape: bf16[1,32,128], index: 3, kind: input, shape index: {}]   ;;  %s2866_s4 = inlined_call_operand.hbm [shape: f32[1,19,1,128], index: 4, kind: output, shape index: {}]  }
   0x1   :  { %10 = vsyncpa [#allocation6], 0 }
   0x2   :  { %11 = vsyncpa [#allocation9], 0 }
   0x3   :  { %12 = vsyncpa [#allocation4], 0  ;;  %s1810_s15 = smov [#allocation5]   ;;  %s1811_s17 = smov [#allocation2]  }
   0x4   :  { %s38_s16 = sshll.u32 %s1810_s15, 4  ;;  %s22_s18 = sshll.u32 %s1811_s17, 4  ;;  %s39_s16 = int_to_ptr.vmem [resolvable:$true] %s38_s16  ;;  %s23_s18 = int_to_ptr.vmem [resolvable:$true] %s22_s18 }
   0x5   :  { %s1710_s19 = scalar_lea.vmem %s39_s16, 3072  ;;  %p1715_p1 = scmp.lt.s32.totalorder %s39_s16, %s39_s16 }
   0x6   :  { %p1711_p0 = scmp.ne.s32.totalorder %s39_s16, %s1710_s19  ;;  %p1716_p2 = scmp.lt.s32.totalorder %s1710_s19, %s1710_s19 }
   0x8   :  { %p1717_p3 = por %p1716_p2, %p1715_p1 }
   0xa   :  { %p1718_p4 = pnand %p1717_p3, %p1711_p0 }
   0xc   :  { %1721 = shalt.err (!%p1718_p4)
}
   0xd   :  { %s1812_s20 = smov 128   ;;  %s1813_s21 = smov 8  }
   0xe   :  { %44 = dma.hbm_to_vmem [thread:$0]  %s2863_s1, 3072, %s39_s16, [#allocation6], %s1812_s20, %s1812_s20, %s1813_s21  }
   0xf   :  { %s1730_s24 = scalar_lea.vmem %s23_s18, 3072  ;;  %p1735_p6 = scmp.lt.s32.totalorder %s23_s18, %s23_s18 }
  0x10   :  { %p1731_p5 = scmp.ne.s32.totalorder %s23_s18, %s1730_s24  ;;  %p1736_p7 = scmp.lt.s32.totalorder %s1730_s24, %s1730_s24 }
  0x12   :  { %p1737_p8 = por %p1736_p7, %p1735_p6 }
  0x14   :  { %p1738_p9 = pnand %p1737_p8, %p1731_p5 }
  0x16   :  { %1741 = shalt.err (!%p1738_p9)
}
  0x17   :  { %28 = dma.hbm_to_vmem [thread:$0]  %s2862_s0, 3072, %s23_s18, [#allocation3], %s1812_s20, %s1812_s20, %s1813_s21  }
  0x18   :  { %s1814_s27 = smov [#allocation7]  }
  0x19   :  { %s54_s28 = sshll.u32 %s1814_s27, 4  ;;  %s55_s28 = int_to_ptr.vmem [resolvable:$true] %s54_s28 }
  0x1a   :  { %s1750_s29 = scalar_lea.vmem %s55_s28, 256  ;;  %p1755_p11 = scmp.lt.s32.totalorder %s55_s28, %s55_s28 }
  0x1b   :  { %p1751_p10 = scmp.ne.s32.totalorder %s55_s28, %s1750_s29  ;;  %p1756_p12 = scmp.lt.s32.totalorder %s1750_s29, %s1750_s29 }
  0x1d   :  { %p1757_p13 = por %p1756_p12, %p1755_p11 }
  0x1f   :  { %p1758_p0 = pnand %p1757_p13, %p1751_p10 }
  0x21   :  { %1761 = shalt.err (!%p1758_p0)
}
  0x22   :  { %s1815_s1 = smov 64   ;;  %s1816_s30 = smov 4  }
  0x23   :  { %60 = dma.hbm_to_vmem [thread:$0]  %s2864_s2, 256, %s55_s28, [#allocation6], %s1815_s1, %s1815_s1, %s1816_s30  }
  0x24   :  { %s1817_s7 = smov [#allocation8]  }
  0x25   :  { %s70_s8 = sshll.u32 %s1817_s7, 4  ;;  %s71_s8 = int_to_ptr.vmem [resolvable:$true] %s70_s8 }
  0x26   :  { %s1770_s0 = scalar_lea.vmem %s71_s8, 256  ;;  %p1775_p2 = scmp.lt.s32.totalorder %s71_s8, %s71_s8 }
  0x27   :  { %p1771_p1 = scmp.ne.s32.totalorder %s71_s8, %s1770_s0  ;;  %p1776_p3 = scmp.lt.s32.totalorder %s1770_s0, %s1770_s0 }
  0x29   :  { %p1777_p4 = por %p1776_p3, %p1775_p2 }
  0x2b   :  { %p1778_p5 = pnand %p1777_p4, %p1771_p1 }
  0x2d   :  { %1781 = shalt.err (!%p1778_p5)
}
  0x2e   :  { %76 = dma.hbm_to_vmem [thread:$0]  %s2865_s3, 256, %s71_s8, [#allocation9], %s1815_s1, %s1815_s1, %s1816_s30  }
  0x2f   :  { %1802 = dma.done.wait [#allocation3], 3072  }
  0x30   :  { %1803 = vsyncadd [#allocation3], 4294964224 }
  0x31   :  { %1804 = dma.done.wait [#allocation6], 3328  }
  0x32   :  { %1805 = vsyncadd [#allocation6], 4294963968 }
  0x33   :  { %1806 = dma.done.wait [#allocation9], 256  }
  0x34   :  { %1807 = vsyncadd [#allocation9], 4294967040  ;;  %v1818_v0 = vmov 0.0   ;;  %v1860_v1 = vld [vmem:[#allocation2] sm:$0xff]  ;;  %v1862_v2 = vld [vmem:[#allocation2 + $0x8] sm:$0xff]  ;;  %s1820_s2 = smov [#allocation10]  }
  0x35   :  { %101 = vst [vmem:[#allocation10] sm:$0x1] %v1818_v0  ;;  %102 = vst [vmem:[#allocation10 + $0x1] sm:$0x1] %v1818_v0  ;;  %v1864_v3 = vld [vmem:[#allocation2 + $0x10] sm:$0xff]  ;;  %v1866_v4 = vld [vmem:[#allocation2 + $0x18] sm:$0xff] }
  0x36   :  { %103 = vst [vmem:[#allocation10 + $0x2] sm:$0x1] %v1818_v0  ;;  %104 = vst [vmem:[#allocation10 + $0x3] sm:$0x1] %v1818_v0  ;;  %v1868_v5 = vld [vmem:[#allocation2 + $0x20] sm:$0xff]  ;;  %v1870_v6 = vld [vmem:[#allocation2 + $0x28] sm:$0xff] }
  0x37   :  { %105 = vst [vmem:[#allocation10 + $0x4] sm:$0x1] %v1818_v0  ;;  %106 = vst [vmem:[#allocation10 + $0x5] sm:$0x1] %v1818_v0  ;;  %v1872_v7 = vld [vmem:[#allocation2 + $0x30] sm:$0xff]  ;;  %v1874_v8 = vld [vmem:[#allocation2 + $0x38] sm:$0xff] }
  0x38   :  { %107 = vst [vmem:[#allocation10 + $0x6] sm:$0x1] %v1818_v0  ;;  %108 = vst [vmem:[#allocation10 + $0x7] sm:$0x1] %v1818_v0  ;;  %v329_v9 = vmul.f32 0.1063355, %v1860_v1 }
  0x39   :  { %109 = vst [vmem:[#allocation10 + $0x8] sm:$0x1] %v1818_v0  ;;  %110 = vst [vmem:[#allocation10 + $0x9] sm:$0x1] %v1818_v0  ;;  %v1877_v10 = vld [vmem:[#allocation2 + $0x40] sm:$0xff]  ;;  %v1879_v11 = vld [vmem:[#allocation2 + $0x48] sm:$0xff] }
  0x3a   :  { %111 = vst [vmem:[#allocation10 + $0xa] sm:$0x1] %v1818_v0  ;;  %112 = vst [vmem:[#allocation10 + $0xb] sm:$0x1] %v1818_v0  ;;  %v1881_v12 = vld [vmem:[#allocation2 + $0x50] sm:$0xff]  ;;  %v1887_v17 = vld [vmem:[#allocation2 + $0x58] sm:$0xff] }
  0x3b   :  { %113 = vst [vmem:[#allocation10 + $0xc] sm:$0x1] %v1818_v0  ;;  %114 = vst [vmem:[#allocation10 + $0xd] sm:$0x1] %v1818_v0  ;;  %v330_v13 = vmul.f32 0.1063355, %v1862_v2 }
  0x3c   :  { %115 = vst [vmem:[#allocation10 + $0xe] sm:$0x1] %v1818_v0  ;;  %116 = vst [vmem:[#allocation10 + $0xf] sm:$0x1] %v1818_v0  ;;  %v331_v14 = vmul.f32 0.1063355, %v1864_v3 }
  0x3d   :  { %117 = vst [vmem:[#allocation10 + $0x10] sm:$0x1] %v1818_v0  ;;  %118 = vst [vmem:[#allocation10 + $0x11] sm:$0x1] %v1818_v0  ;;  %v332_v15 = vmul.f32 0.1063355, %v1866_v4 }
  0x3e   :  { %119 = vst [vmem:[#allocation10 + $0x12] sm:$0x1] %v1818_v0  ;;  %2910 = vst [vmem:[#allocation15_spill] sm:$0xff] %v1868_v5  ;;  %v337_v16 = vmul.f32 0.35758, %v1868_v5  ;;  %v1898_v34 = vld [vmem:[#allocation2 + $0x60] sm:$0xff] }
  0x3f   :  { %2911 = vst [vmem:[#allocation16_spill] sm:$0xff] %v1870_v6  ;;  %2912 = vst [vmem:[#allocation17_spill] sm:$0xff] %v1872_v7  ;;  %v338_v18 = vmul.f32 0.35758, %v1870_v6  ;;  %v339_v19 = vmul.f32 0.35758, %v1872_v7 }
  0x40   :  { %2913 = vst [vmem:[#allocation18_spill] sm:$0xff] %v1877_v10  ;;  %2914 = vst [vmem:[#allocation19_spill] sm:$0xff] %v1879_v11  ;;  %v340_v20 = vmul.f32 0.35758, %v1874_v8  ;;  %v345_v21 = vadd.f32 %v337_v16, %v329_v9  ;;  %v353_v22 = vmul.f32 0.0360845, %v1877_v10 }
  0x41   :  { %2915 = vst [vmem:[#allocation20_spill] sm:$0xff] %v1881_v12  ;;  %2916 = vst [vmem:[#allocation21_spill] sm:$0xff] %v1887_v17  ;;  %v354_v23 = vmul.f32 0.0360845, %v1879_v11  ;;  %v355_v24 = vmul.f32 0.0360845, %v1881_v12  ;;  %v346_v25 = vadd.f32 %v338_v18, %v330_v13  ;;  %v347_v26 = vadd.f32 %v339_v19, %v331_v14 }
  0x42   :  { %v348_v27 = vadd.f32 %v340_v20, %v332_v15  ;;  %v356_v28 = vmul.f32 0.0360845, %v1887_v17  ;;  %v361_v29 = vadd.f32 %v353_v22, %v345_v21  ;;  %v1900_v35 = vld [vmem:[#allocation2 + $0x80] sm:$0xff]  ;;  %v1909_v40 = vld [vmem:[#allocation2 + $0x68] sm:$0xff]  ;;  %v1911_v41 = vld [vmem:[#allocation2 + $0x70] sm:$0xff]  ;;  %s1401_s3 = sshll.u32 %s1820_s2, 4  ;;  %s1402_s3 = int_to_ptr.vmem [resolvable:$true] %s1401_s3 }
  0x43   :  { %v362_v30 = vadd.f32 %v354_v23, %v346_v25  ;;  %v363_v31 = vadd.f32 %v355_v24, %v347_v26  ;;  %2917 = vst [vmem:[#allocation22_spill] sm:$0xff] %v1900_v35  ;;  %v1913_v42 = vld [vmem:[#allocation2 + $0x78] sm:$0xff]  ;;  %v333_v43 = vmul.f32 0.1063355, %v1898_v34  ;;  %v341_v44 = vmul.f32 0.35758, %v1900_v35  ;;  %p1787_p7 = scmp.lt.s32.totalorder %s1402_s3, %s1402_s3 }
  0x44   :  { %v364_v32 = vadd.f32 %v356_v28, %v348_v27  ;;  %v1896_v33 = vadd.f32 0.5, %v361_v29  ;;  %2918 = vst [vmem:[#allocation23_spill] sm:$0xff] %v1913_v42  ;;  %v1920_v48 = vld [vmem:[#allocation2 + $0x88] sm:$0xff]  ;;  %v1922_v49 = vld [vmem:[#allocation2 + $0x90] sm:$0xff]  ;;  %v1924_v50 = vld [vmem:[#allocation2 + $0x98] sm:$0xff]  ;;  %s1782_s11 = scalar_lea.vmem %s1402_s3, 304 }
  0x45   :  { %v1902_v36 = vadd.f32 0.5, %v362_v30  ;;  %v1904_v37 = vadd.f32 0.5, %v363_v31  ;;  %2919 = vst [vmem:[#allocation24_spill] sm:$0xff] %v1920_v48  ;;  %2920 = vst [vmem:[#allocation25_spill] sm:$0xff] %v1924_v50  ;;  %v1926_v51 = vld [vmem:[#allocation2 + $0xa0] sm:$0xff]  ;;  %v1928_v52 = vld [vmem:[#allocation2 + $0xa8] sm:$0xff]  ;;  %v349_v58 = vadd.f32 %v341_v44, %v333_v43  ;;  %p1783_p6 = scmp.ne.s32.totalorder %s1402_s3, %s1782_s11 }
  0x46   :  { %v1906_v38 = vadd.f32 0.5, %v364_v32  ;;  %v593_v39 = vmax.f32 %v1896_v33, 0.008856  ;;  %2921 = vst [vmem:[#allocation26_spill] sm:$0xff] %v1926_v51  ;;  %2922 = vst [vmem:[#allocation27_spill] sm:$0xff] %v1928_v52  ;;  %v1931_v54 = vld [vmem:[#allocation2 + $0xb0] sm:$0xff] }
  0x47   :  { %v594_v45 = vmax.f32 %v1902_v36, 0.008856  ;;  %v595_v46 = vmax.f32 %v1904_v37, 0.008856  ;;  %v334_v53 = vmul.f32 0.1063355, %v1909_v40 }
  0x48   :  { %v596_v47 = vmax.f32 %v1906_v38, 0.008856  ;;  %1462 = vlog2.f32 %v593_v39  ;;  %2923 = vst [vmem:[#allocation28_spill] sm:$0xff] %v1931_v54  ;;  %v1933_v55 = vld [vmem:[#allocation2 + $0xb8] sm:$0xff]  ;;  %v335_v56 = vmul.f32 0.1063355, %v1911_v41 }
  0x49   :  { %1464 = vlog2.f32 %v594_v45  ;;  %2924 = vst [vmem:[#allocation29_spill] sm:$0xff] %v1933_v55  ;;  %v336_v57 = vmul.f32 0.1063355, %v1913_v42  ;;  %v641_v59 = vmul.f32 7.787, %v1896_v33  ;;  %v1432_v43 = vld [vmem:[#allocation7] sm:$0xff]  }
  0x4a   :  { %1466 = vlog2.f32 %v595_v46  ;;  %v342_v60 = vmul.f32 0.35758, %v1920_v48  ;;  %v343_v61 = vmul.f32 0.35758, %v1922_v49  ;;  %v344_v62 = vmul.f32 0.35758, %v1924_v50 }
  0x4b   :  { %1468 = vlog2.f32 %v596_v47  ;;  %v357_v63 = vmul.f32 0.0360845, %v1926_v51  ;;  %v358_v9 = vmul.f32 0.0360845, %v1928_v52  ;;  %v359_v13 = vmul.f32 0.0360845, %v1931_v54 }
  0x4c   :  { %v350_v0 = vadd.f32 %v342_v60, %v334_v53  ;;  %v360_v14 = vmul.f32 0.0360845, %v1933_v55  ;;  %v642_v15 = vmul.f32 7.787, %v1902_v36  ;;  %v351_v16 = vadd.f32 %v343_v61, %v335_v56  ;;  %s1786_s12 = scalar_lea.vmem %s1402_s3, 320 }
  0x4d   :  { %v352_v18 = vadd.f32 %v344_v62, %v336_v57  ;;  %v365_v19 = vadd.f32 %v357_v63, %v349_v58  ;;  %v643_v20 = vmul.f32 7.787, %v1904_v37  ;;  %v644_v21 = vmul.f32 7.787, %v1906_v38  ;;  %p1788_p8 = scmp.lt.s32.totalorder %s1786_s12, %s1782_s11 }
  0x4e   :  { %v366_v22 = vadd.f32 %v358_v9, %v350_v0  ;;  %v1948_v23 = vadd.f32 0.137931, %v641_v59  ;;  %v367_v24 = vadd.f32 %v359_v13, %v351_v16  ;;  %v1953_v27 = vmul.f32 903.3, %v1896_v33 }
  0x4f   :  { %v368_v25 = vadd.f32 %v360_v14, %v352_v18  ;;  %v1950_v26 = vadd.f32 0.5, %v365_v19  ;;  %v1956_v28 = vmul.f32 903.3, %v1902_v36  ;;  %v1960_v30 = vadd.f32 0.137931, %v642_v15  ;;  %p1789_p9 = por %p1788_p8, %p1787_p7 }
  0x50   :  { %v1958_v29 = vadd.f32 0.5, %v366_v22  ;;  %v1962_v31 = vadd.f32 0.5, %v367_v24  ;;  %v1967_v44 = vadd.f32 0.137931, %v643_v20  ;;  %v1969_v45 = vadd.f32 0.137931, %v644_v21 }
  0x51   :  { %v1964_v32 = vadd.f32 0.5, %v368_v25  ;;  %v597_v39 = vmax.f32 %v1950_v26, 0.008856  ;;  %v1973_v53 = vmul.f32 903.3, %v1904_v37  ;;  %v1983_v18 = vunpack.c.l.bf16 %v1432_v43  ;;  %p1790_p10 = pnand %p1789_p9, %p1783_p6 }
  0x52   :  { %v598_v46 = vmax.f32 %v1958_v29, 0.008856  ;;  %v599_v56 = vmax.f32 %v1962_v31, 0.008856  ;;  %v281_v57 = vmul.f32 0.21697637, %v1860_v1  ;;  %v1987_v22 = vunpack.c.h.bf16 %v1432_v43 }
  0x53   :  { %1470 = vlog2.f32 %v597_v39  ;;  %v600_v59 = vmax.f32 %v1964_v32, 0.008856  ;;  %v282_v60 = vmul.f32 0.21697637, %v1862_v2  ;;  %v283_v62 = vmul.f32 0.21697637, %v1864_v3 }
  0x54   :  { %1472 = vlog2.f32 %v598_v46  ;;  %v284_v63 = vmul.f32 0.21697637, %v1866_v4  ;;  %v289_v0 = vmul.f32 0.18810971, %v1868_v5  ;;  %v290_v15 = vmul.f32 0.18810971, %v1870_v6 }
  0x55   :  { %v1463_v47 = vpop.eup %1462  ;;  %1474 = vlog2.f32 %v599_v56  ;;  %2925 = vst [vmem:[#allocation30_spill] sm:$0xff] %v1983_v18  ;;  %v645_v20 = vmul.f32 7.787, %v1950_v26  ;;  %v291_v21 = vmul.f32 0.18810971, %v1872_v7  ;;  %2926 = vst [vmem:[#allocation31_spill] sm:$0xff] %v1987_v22 }
  0x56   :  { %v602_v58 = vmul.f32 0.6931472, %v1463_v47  ;;  %v1465_v61 = vpop.eup %1464  ;;  %1476 = vlog2.f32 %v600_v59  ;;  %v646_v47 = vmul.f32 7.787, %v1958_v29  ;;  %v647_v56 = vmul.f32 7.787, %v1962_v31 }
  0x57   :  { %v1467_v9 = vpop.eup %1466  ;;  %v604_v13 = vmul.f32 0.6931472, %v1465_v61  ;;  %v298_v6 = vadd.f32 %v290_v15, %v282_v60  ;;  %v648_v5 = vmul.f32 7.787, %v1964_v32  ;;  %v292_v7 = vmul.f32 0.18810971, %v1874_v8 }
  0x58   :  { %v617_v14 = vmul.f32 0.33333334, %v602_v58  ;;  %v1469_v16 = vpop.eup %1468  ;;  %v606_v19 = vmul.f32 0.6931472, %v1467_v9  ;;  %v297_v58 = vadd.f32 %v289_v0, %v281_v57  ;;  %v299_v43 = vadd.f32 %v291_v21, %v283_v62  ;;  %v1447_v21 = vld [vmem:[#allocation7 + $0x8] sm:$0xff]  }
  0x59   :  { %v608_v24 = vmul.f32 0.6931472, %v1469_v16  ;;  %v618_v25 = vmul.f32 0.33333334, %v604_v13  ;;  %v305_v13 = vmul.f32 0.094913915, %v1877_v10  ;;  %v300_v57 = vadd.f32 %v292_v7, %v284_v63 }
  0x5a   :  { %v625_v39 = vmul.f32 1.442695, %v617_v14  ;;  %v619_v46 = vmul.f32 0.33333334, %v606_v19  ;;  %v306_v14 = vmul.f32 0.094913915, %v1879_v11 }
  0x5b   :  { %v620_v59 = vmul.f32 0.33333334, %v608_v24  ;;  %v627_v61 = vmul.f32 1.442695, %v618_v25  ;;  %vm585_vm0 = vcmp.gt.f32.partialorder %v1896_v33, 0.008856  ;;  %v313_v19 = vadd.f32 %v305_v13, %v297_v58 }
  0x5c   :  { %1478 = vpow2.f32 %v625_v39  ;;  %v629_v9 = vmul.f32 1.442695, %v619_v46  ;;  %v307_v0 = vmul.f32 0.094913915, %v1881_v12  ;;  %v308_v60 = vmul.f32 0.094913915, %v1887_v17 }
  0x5d   :  { %1480 = vpow2.f32 %v627_v61  ;;  %v631_v16 = vmul.f32 1.442695, %v620_v59  ;;  %v1999_v15 = vmul.f32 903.3, %v1906_v38  ;;  %v314_v62 = vadd.f32 %v306_v14, %v298_v6 }
  0x5e   :  { %1482 = vpow2.f32 %v629_v9  ;;  %vm586_vm1 = vcmp.gt.f32.partialorder %v1902_v36, 0.008856  ;;  %v2002_v24 = vadd.f32 0.137931, %v645_v20  ;;  %v2004_v25 = vadd.f32 0.137931, %v646_v47 }
  0x5f   :  { %1484 = vpow2.f32 %v631_v16  ;;  %v315_v39 = vadd.f32 %v307_v0, %v299_v43  ;;  %v316_v46 = vadd.f32 %v308_v60, %v300_v57  ;;  %vm587_vm2 = vcmp.gt.f32.partialorder %v1904_v37, 0.008856 }
  0x60   :  { %v1471_v7 = vpop.eup %1470  ;;  %v2007_v63 = vadd.f32 0.137931, %v647_v56  ;;  %v2009_v59 = vadd.f32 0.137931, %v648_v5  ;;  %v2011_v61 = vadd.f32 0.5, %v313_v19  ;;  %v2013_v58 = vadd.f32 0.5, %v314_v62 }
  0x61   :  { %v1473_v6 = vpop.eup %1472  ;;  %vm588_vm3 = vcmp.gt.f32.partialorder %v1906_v38, 0.008856  ;;  %v610_v20 = vmul.f32 0.6931472, %v1471_v7  ;;  %v2017_v47 = vmul.f32 903.3, %v1950_v26  ;;  %v2023_v56 = vunpack.c.l.bf16 %v1447_v21 }
  0x62   :  { %v2019_v9 = vadd.f32 0.5, %v315_v39  ;;  %v2021_v43 = vadd.f32 0.5, %v316_v46  ;;  %v1475_v16 = vpop.eup %1474  ;;  %v612_v5 = vmul.f32 0.6931472, %v1473_v6  ;;  %v425_v13 = vmax.f32 %v2011_v61, 0.008856 }
  0x63   :  { %2927 = vst [vmem:[#allocation32_spill] sm:$0xff] %v2023_v56  ;;  %v426_v14 = vmax.f32 %v2013_v58, 0.008856  ;;  %v1477_v57 = vpop.eup %1476  ;;  %v2027_v0 = vunpack.c.h.bf16 %v1447_v21  ;;  %v614_v60 = vmul.f32 0.6931472, %v1475_v16 }
  0x64   :  { %v621_v19 = vmul.f32 0.33333334, %v610_v20  ;;  %v427_v62 = vmax.f32 %v2019_v9, 0.008856  ;;  %v616_v7 = vmul.f32 0.6931472, %v1477_v57  ;;  %1486 = vlog2.f32 %v425_v13 }
  0x65   :  { %2928 = vst [vmem:[#allocation33_spill] sm:$0xff] %v2027_v0  ;;  %v622_v39 = vmul.f32 0.33333334, %v612_v5  ;;  %v2031_v46 = vmul.f32 903.3, %v1958_v29  ;;  %1488 = vlog2.f32 %v426_v14 }
  0x66   :  { %v623_v17 = vmul.f32 0.33333334, %v614_v60  ;;  %v633_v12 = vmul.f32 1.442695, %v621_v19  ;;  %v285_v6 = vmul.f32 0.21697637, %v1898_v34  ;;  %1490 = vlog2.f32 %v427_v62 }
  0x67   :  { %v624_v11 = vmul.f32 0.33333334, %v616_v7  ;;  %v635_v10 = vmul.f32 1.442695, %v622_v39  ;;  %v286_v21 = vmul.f32 0.21697637, %v1909_v40 }
  0x68   :  { %1492 = vpow2.f32 %v633_v12  ;;  %v637_v20 = vmul.f32 1.442695, %v623_v17  ;;  %v428_v57 = vmax.f32 %v2021_v43, 0.008856  ;;  %v293_v5 = vmul.f32 0.18810971, %v1900_v35 }
  0x69   :  { %v1479_v16 = vpop.eup %1478  ;;  %1494 = vpow2.f32 %v635_v10  ;;  %v639_v14 = vmul.f32 1.442695, %v624_v11  ;;  %v294_v60 = vmul.f32 0.18810971, %v1920_v48  ;;  %v2045_v12 = vmul.f32 903.3, %v1962_v31 }
  0x6a   :  { %v2040_v13 = vsel %vm585_vm0, %v1479_v16, %v1948_v23  ;;  %v1481_v19 = vpop.eup %1480  ;;  %1496 = vpow2.f32 %v637_v20  ;;  %v2048_v17 = vmul.f32 903.3, %v1964_v32  ;;  %vm589_vm4 = vcmp.gt.f32.partialorder %v1950_v26, 0.008856 }
  0x6b   :  { %v665_v62 = vmul.f32 116.0, %v2040_v13  ;;  %v1483_v7 = vpop.eup %1482  ;;  %v2053_v23 = vsel %vm586_vm1, %v1481_v19, %v1960_v30  ;;  %1498 = vpow2.f32 %v639_v14  ;;  %v287_v10 = vmul.f32 0.21697637, %v1911_v41 }
  0x6c   :  { %v288_v11 = vmul.f32 0.21697637, %v1913_v42  ;;  %v1485_v39 = vpop.eup %1484  ;;  %v2061_v16 = vsel %vm587_vm2, %v1483_v7, %v1967_v44  ;;  %v666_v20 = vmul.f32 116.0, %v2053_v23  ;;  %vm590_vm5 = vcmp.gt.f32.partialorder %v1958_v29, 0.008856 }
  0x6d   :  { %v1415_v48 = vadd.f32 -16.0, %v665_v62  ;;  %1500 = vlog2.f32 %v428_v57  ;;  %v2068_v30 = vsel %vm588_vm3, %v1485_v39, %v1969_v45  ;;  %v667_v14 = vmul.f32 116.0, %v2061_v16 }
  0x6e   :  { %vm591_vm6 = vcmp.gt.f32.partialorder %v1962_v31, 0.008856  ;;  %v301_v19 = vadd.f32 %v293_v5, %v285_v6  ;;  %v302_v42 = vadd.f32 %v294_v60, %v286_v21  ;;  %v668_v44 = vmul.f32 116.0, %v2068_v30 }
  0x6f   :  { %v1416_v7 = vadd.f32 -16.0, %v666_v20  ;;  %v689_v62 = vsel %vm585_vm0, %v1415_v48, %v1953_v27  ;;  %vm592_vm7 = vcmp.gt.f32.partialorder %v1964_v32, 0.008856  ;;  %v2078_v57 = vmul.f32 7.787, %v2011_v61 }
  0x70   :  { %v1417_v45 = vadd.f32 -16.0, %v667_v14  ;;  %v1113_v39 = vmul.f32 %v1983_v18, %v689_v62  ;;  %v295_v35 = vmul.f32 0.18810971, %v1922_v49  ;;  %v296_v6 = vmul.f32 0.18810971, %v1924_v50 }
  0x71   :  { %v1418_v21 = vadd.f32 -16.0, %v668_v44  ;;  %v690_v5 = vsel %vm586_vm1, %v1416_v7, %v1956_v28  ;;  %v309_v33 = vmul.f32 0.094913915, %v1926_v51  ;;  %v310_v48 = vmul.f32 0.094913915, %v1928_v52  ;;  %v1487_v62 = vpop.eup %1486 }
  0x72   :  { %v691_v27 = vsel %vm587_vm2, %v1417_v45, %v1973_v53  ;;  %v1114_v60 = vmul.f32 %v1987_v22, %v690_v5  ;;  %v303_v20 = vadd.f32 %v295_v35, %v287_v10  ;;  %v304_v14 = vadd.f32 %v296_v6, %v288_v11  ;;  %v1489_v52 = vpop.eup %1488 }
  0x73   :  { %v692_v44 = vsel %vm588_vm3, %v1418_v21, %v1999_v15  ;;  %v1115_v36 = vmul.f32 %v2023_v56, %v691_v27  ;;  %v311_v28 = vmul.f32 0.094913915, %v1931_v54  ;;  %v312_v7 = vmul.f32 0.094913915, %v1933_v55  ;;  %v1491_v5 = vpop.eup %1490 }
  0x74   :  { %v1116_v51 = vmul.f32 %v2027_v0, %v692_v44  ;;  %v1121_v37 = vadd.f32 %v1114_v60, %v1113_v39  ;;  %v434_v53 = vmul.f32 0.6931472, %v1487_v62  ;;  %v317_v45 = vadd.f32 %v309_v33, %v301_v19 }
  0x75   :  { %v436_v35 = vmul.f32 0.6931472, %v1489_v52  ;;  %v318_v10 = vadd.f32 %v310_v48, %v302_v42  ;;  %v319_v11 = vadd.f32 %v311_v28, %v303_v20  ;;  %v320_v6 = vadd.f32 %v312_v7, %v304_v14  ;;  %v1493_v50 = vpop.eup %1492 }
  0x76   :  { %v1122_v38 = vadd.f32 %v1121_v37, %v1115_v36  ;;  %v438_v15 = vmul.f32 0.6931472, %v1491_v5  ;;  %v449_v21 = vmul.f32 0.33333334, %v434_v53  ;;  %v2099_v27 = vadd.f32 0.5, %v317_v45  ;;  %v1495_v54 = vpop.eup %1494 }
  0x77   :  { %v2104_v55 = vsel %vm589_vm4, %v1493_v50, %v2002_v24  ;;  %v450_v39 = vmul.f32 0.33333334, %v436_v35  ;;  %v2106_v60 = vadd.f32 0.5, %v318_v10  ;;  %v2108_v19 = vadd.f32 0.5, %v319_v11  ;;  %v1497_v42 = vpop.eup %1496 }
  0x78   :  { %v1123_v52 = vadd.f32 %v1122_v38, %v1116_v51  ;;  %v2113_v33 = vsel %vm590_vm5, %v1495_v54, %v2004_v25  ;;  %v669_v48 = vmul.f32 116.0, %v2104_v55  ;;  %v451_v20 = vmul.f32 0.33333334, %v438_v15  ;;  %v1499_v14 = vpop.eup %1498 }
  0x79   :  { %v2119_v50 = vsel %vm591_vm6, %v1497_v42, %v2007_v63  ;;  %v670_v24 = vmul.f32 116.0, %v2113_v33  ;;  %v457_v62 = vmul.f32 1.442695, %v449_v21  ;;  %v459_v44 = vmul.f32 1.442695, %v450_v39 }
  0x7a   :  { %v1501_v36 = vpop.eup %1500  ;;  %v1124_v51 = vrot.slane %v1123_v52, 4  ;;  %v2125_v54 = vsel %vm592_vm7, %v1499_v14, %v2009_v59  ;;  %v671_v25 = vmul.f32 116.0, %v2119_v50  ;;  %v1419_v28 = vadd.f32 -16.0, %v669_v48 }
  0x7b   :  { %v672_v7 = vmul.f32 116.0, %v2125_v54  ;;  %v1420_v37 = vadd.f32 -16.0, %v670_v24  ;;  %v440_v53 = vmul.f32 0.6931472, %v1501_v36  ;;  %1502 = vpow2.f32 %v457_v62 }
  0x7c   :  { %v1125_v63 = vadd.f32 %v1124_v51, %v1123_v52  ;;  %v1421_v45 = vadd.f32 -16.0, %v671_v25  ;;  %v693_v5 = vsel %vm589_vm4, %v1419_v28, %v2017_v47  ;;  %1504 = vpow2.f32 %v459_v44 }
  0x7d   :  { %v1422_v35 = vadd.f32 -16.0, %v672_v7  ;;  %v694_v59 = vsel %vm590_vm5, %v1420_v37, %v2031_v46  ;;  %v1117_v10 = vmul.f32 %v1983_v18, %v693_v5  ;;  %v452_v11 = vmul.f32 0.33333334, %v440_v53 }
  0x7e   :  { %v1126_v38 = vrot.slane %v1125_v63, 2  ;;  %v695_v15 = vsel %vm591_vm6, %v1421_v45, %v2045_v12  ;;  %v1118_v21 = vmul.f32 %v1987_v22, %v694_v59  ;;  %v461_v39 = vmul.f32 1.442695, %v451_v20 }
  0x7f   :  { %v696_v26 = vsel %vm592_vm7, %v1422_v35, %v2048_v17  ;;  %v1119_v47 = vmul.f32 %v2023_v56, %v695_v15  ;;  %v463_v42 = vmul.f32 1.442695, %v452_v11  ;;  %v2144_v29 = vadd.f32 0.5, %v320_v6  ;;  %v1339_v6 = vld [vmem:[#allocation10] sm:$0x1] }
  0x80   :  { %v1127_v46 = vadd.f32 %v1126_v38, %v1125_v63  ;;  %v1120_v52 = vmul.f32 %v2027_v0, %v696_v26  ;;  %v1130_v48 = vadd.f32 %v1118_v21, %v1117_v10  ;;  %1506 = vpow2.f32 %v461_v39 }
  0x81   :  { %1508 = vpow2.f32 %v463_v42  ;;  %v429_v31 = vmax.f32 %v2099_v27, 0.008856  ;;  %v430_v12 = vmax.f32 %v2106_v60, 0.008856  ;;  %v431_v20 = vmax.f32 %v2108_v19, 0.008856 }
  0x82   :  { %v1128_v14 = vrot.slane %v1127_v46, 1  ;;  %v1131_v32 = vadd.f32 %v1130_v48, %v1119_v47  ;;  %v482_v17 = vmul.f32 7.787, %v2013_v58  ;;  %v432_v24 = vmax.f32 %v2144_v29, 0.008856 }
  0x83   :  { %v483_v62 = vmul.f32 7.787, %v2019_v9  ;;  %v484_v44 = vmul.f32 7.787, %v2021_v43  ;;  %1510 = vlog2.f32 %v429_v31  ;;  %vm473_vm8 = vcmp.gt.f32.partialorder %v2011_v61, 0.008856 }
  0x84   :  { %v1129_v36 = vadd.f32 %v1128_v14, %v1127_v46  ;;  %v1132_v51 = vadd.f32 %v1131_v32, %v1120_v52  ;;  %1512 = vlog2.f32 %v430_v12  ;;  %vm474_vm9 = vcmp.gt.f32.partialorder %v2013_v58, 0.008856  ;;  %v2929_v12 = vld [vmem:[#allocation15_spill] sm:$0xff] }
  0x85   :  { %vm475_vm10 = vcmp.gt.f32.partialorder %v2019_v9, 0.008856  ;;  %v489_v25 = vadd.f32 0.137931, %v2078_v57  ;;  %1514 = vlog2.f32 %v431_v20  ;;  %v490_v37 = vadd.f32 0.137931, %v482_v17 }
  0x86   :  { %v1358_v28 = vadd.f32 %v1339_v6, %v1129_v36  ;;  %v1133_v7 = vrot.slane %v1132_v51, 4  ;;  %1516 = vlog2.f32 %v432_v24  ;;  %vm476_vm11 = vcmp.gt.f32.partialorder %v2021_v43, 0.008856  ;;  %v1340_v6 = vld [vmem:[#allocation10 + $0x1] sm:$0x1] }
  0x87   :  { %v491_v53 = vadd.f32 0.137931, %v483_v62  ;;  %v492_v63 = vadd.f32 0.137931, %v484_v44  ;;  %v1165_v45 = vmul.f32 %v1983_v18, %v2040_v13  ;;  %v1166_v59 = vmul.f32 %v1987_v22, %v2053_v23  ;;  %v2931_v44 = vld [vmem:[#allocation17_spill] sm:$0xff] }
  0x88   :  { %v1503_v5 = vpop.eup %1502  ;;  %1377 = vst [vmem:[#allocation10] sm:$0x1] %v1358_v28  ;;  %v1134_v35 = vadd.f32 %v1133_v7, %v1132_v51  ;;  %v1167_v57 = vmul.f32 %v2023_v56, %v2061_v16  ;;  %v1168_v10 = vmul.f32 %v2027_v0, %v2068_v30  ;;  %v1169_v15 = vmul.f32 %v1983_v18, %v2104_v55 }
  0x89   :  { %v1505_v11 = vpop.eup %1504  ;;  %v497_v38 = vsel %vm473_vm8, %v1503_v5, %v489_v25  ;;  %v1170_v13 = vmul.f32 %v1987_v22, %v2113_v33  ;;  %v1171_v21 = vmul.f32 %v2023_v56, %v2119_v50  ;;  %v1173_v30 = vadd.f32 %v1166_v59, %v1165_v45 }
  0x8a   :  { %v1135_v23 = vrot.slane %v1134_v35, 2  ;;  %v498_v16 = vsel %vm474_vm9, %v1505_v11, %v490_v37  ;;  %v1139_v39 = vmul.f32 %v1983_v18, %v497_v38  ;;  %v1172_v61 = vmul.f32 %v2027_v0, %v2125_v54 }
  0x8b   :  { %v1140_v26 = vmul.f32 %v1987_v22, %v498_v16  ;;  %v1182_v47 = vadd.f32 %v1170_v13, %v1169_v15  ;;  %v377_v55 = vmul.f32 0.0088789575, %v1860_v1  ;;  %v1174_v33 = vadd.f32 %v1173_v30, %v1167_v57  ;;  %v2930_v1 = vld [vmem:[#allocation16_spill] sm:$0xff] }
  0x8c   :  { %v1136_v42 = vadd.f32 %v1135_v23, %v1134_v35  ;;  %v378_v46 = vmul.f32 0.0088789575, %v1862_v2  ;;  %v379_v50 = vmul.f32 0.0088789575, %v1864_v3  ;;  %v380_v31 = vmul.f32 0.0088789575, %v1866_v4 }
  0x8d   :  { %v1507_v52 = vpop.eup %1506  ;;  %v1147_v58 = vadd.f32 %v1140_v26, %v1139_v39  ;;  %v1183_v48 = vadd.f32 %v1182_v47, %v1171_v21  ;;  %v385_v20 = vmul.f32 0.05473826, %v2929_v12  ;;  %v1175_v17 = vadd.f32 %v1174_v33, %v1168_v10 }
  0x8e   :  { %v1509_v14 = vpop.eup %1508  ;;  %v1137_v32 = vrot.slane %v1136_v42, 1  ;;  %v499_v54 = vsel %vm475_vm10, %v1507_v52, %v491_v53  ;;  %v386_v24 = vmul.f32 0.05473826, %v2930_v1  ;;  %v387_v36 = vmul.f32 0.05473826, %v2931_v44 }
  0x8f   :  { %v500_v2 = vsel %vm476_vm11, %v1509_v14, %v492_v63  ;;  %v1141_v3 = vmul.f32 %v2023_v56, %v499_v54  ;;  %v1184_v62 = vadd.f32 %v1183_v48, %v1172_v61  ;;  %v1176_v28 = vrot.slane %v1175_v17, 4 }
  0x90   :  { %v1511_v4 = vpop.eup %1510  ;;  %v1138_v51 = vadd.f32 %v1137_v32, %v1136_v42  ;;  %v1142_v25 = vmul.f32 %v2027_v0, %v500_v2  ;;  %v388_v9 = vmul.f32 0.05473826, %v1874_v8  ;;  %v393_v5 = vadd.f32 %v385_v20, %v377_v55  ;;  %v2932_v20 = vld [vmem:[#allocation18_spill] sm:$0xff]  ;;  %v2934_v2 = vld [vmem:[#allocation20_spill] sm:$0xff] }
  0x91   :  { %v1513_v7 = vpop.eup %1512  ;;  %v1148_v37 = vadd.f32 %v1147_v58, %v1141_v3  ;;  %v442_v53 = vmul.f32 0.6931472, %v1511_v4  ;;  %v1185_v45 = vrot.slane %v1184_v62, 4  ;;  %v1177_v59 = vadd.f32 %v1176_v28, %v1175_v17  ;;  %v2933_v17 = vld [vmem:[#allocation19_spill] sm:$0xff]  ;;  %v2935_v3 = vld [vmem:[#allocation21_spill] sm:$0xff] }
  0x92   :  { %v1515_v35 = vpop.eup %1514  ;;  %v1359_v43 = vadd.f32 %v1340_v6, %v1138_v51  ;;  %v444_v63 = vmul.f32 0.6931472, %v1513_v7  ;;  %v394_v57 = vadd.f32 %v386_v24, %v378_v46  ;;  %v395_v8 = vadd.f32 %v387_v36, %v379_v50  ;;  %v1343_v50 = vld [vmem:[#allocation10 + $0x4] sm:$0x1]  ;;  %v1344_v6 = vld [vmem:[#allocation10 + $0x5] sm:$0x1] }
  0x93   :  { %v1517_v10 = vpop.eup %1516  ;;  %v1149_v11 = vadd.f32 %v1148_v37, %v1142_v25  ;;  %v446_v38 = vmul.f32 0.6931472, %v1515_v35  ;;  %v453_v15 = vmul.f32 0.33333334, %v442_v53  ;;  %v1186_v13 = vadd.f32 %v1185_v45, %v1184_v62  ;;  %v1341_v53 = vld [vmem:[#allocation10 + $0x2] sm:$0x1] }
  0x94   :  { %1378 = vst [vmem:[#allocation10 + $0x1] sm:$0x1] %v1359_v43  ;;  %v448_v21 = vmul.f32 0.6931472, %v1517_v10  ;;  %v454_v23 = vmul.f32 0.33333334, %v444_v63  ;;  %v396_v33 = vadd.f32 %v388_v9, %v380_v31 }
  0x95   :  { %v1178_v16 = vrot.slane %v1177_v59, 2  ;;  %v1150_v39 = vrot.slane %v1149_v11, 4  ;;  %v455_v30 = vmul.f32 0.33333334, %v446_v38  ;;  %v465_v26 = vmul.f32 1.442695, %v453_v15 }
  0x96   :  { %v1187_v61 = vrot.slane %v1186_v13, 2  ;;  %v456_v47 = vmul.f32 0.33333334, %v448_v21  ;;  %v467_v55 = vmul.f32 1.442695, %v454_v23 }
  0x97   :  { %v1179_v42 = vadd.f32 %v1178_v16, %v1177_v59  ;;  %v1151_v52 = vadd.f32 %v1150_v39, %v1149_v11  ;;  %1518 = vpow2.f32 %v465_v26  ;;  %v469_v46 = vmul.f32 1.442695, %v455_v30 }
  0x98   :  { %v1188_v58 = vadd.f32 %v1187_v61, %v1186_v13  ;;  %1520 = vpow2.f32 %v467_v55  ;;  %v471_v48 = vmul.f32 1.442695, %v456_v47  ;;  %v401_v14 = vmul.f32 0.43638277, %v2932_v20  ;;  %v2936_v47 = vld [vmem:[#allocation22_spill] sm:$0xff] }
  0x99   :  { %v1180_v12 = vrot.slane %v1179_v42, 1  ;;  %v1152_v32 = vrot.slane %v1151_v52, 2  ;;  %1522 = vpow2.f32 %v469_v46  ;;  %v402_v1 = vmul.f32 0.43638277, %v2933_v17 }
  0x9a   :  { %v1189_v54 = vrot.slane %v1188_v58, 1  ;;  %1524 = vpow2.f32 %v471_v48  ;;  %v403_v31 = vmul.f32 0.43638277, %v2934_v2  ;;  %v404_v62 = vmul.f32 0.43638277, %v2935_v3  ;;  %v2938_v48 = vld [vmem:[#allocation24_spill] sm:$0xff] }
  0x9b   :  { %v1181_v24 = vadd.f32 %v1180_v12, %v1179_v42  ;;  %v1153_v44 = vadd.f32 %v1152_v32, %v1151_v52  ;;  %v409_v4 = vadd.f32 %v401_v14, %v393_v5  ;;  %v410_v51 = vadd.f32 %v402_v1, %v394_v57  ;;  %v2937_v52 = vld [vmem:[#allocation23_spill] sm:$0xff]  ;;  %v2939_v14 = vld [vmem:[#allocation25_spill] sm:$0xff] }
  0x9c   :  { %v1190_v36 = vadd.f32 %v1189_v54, %v1188_v58  ;;  %v485_v25 = vmul.f32 7.787, %v2099_v27  ;;  %v411_v9 = vadd.f32 %v403_v31, %v395_v8  ;;  %v412_v7 = vadd.f32 %v404_v62, %v396_v33  ;;  %v2941_v62 = vld [vmem:[#allocation27_spill] sm:$0xff] }
  0x9d   :  { %v1362_v28 = vadd.f32 %v1343_v50, %v1181_v24  ;;  %v1154_v37 = vrot.slane %v1153_v44, 1  ;;  %v2200_v35 = vadd.f32 0.5, %v409_v4  ;;  %v2202_v43 = vadd.f32 0.5, %v410_v51  ;;  %v2943_v51 = vld [vmem:[#allocation29_spill] sm:$0xff] }
  0x9e   :  { %v1363_v45 = vadd.f32 %v1344_v6, %v1190_v36  ;;  %v486_v63 = vmul.f32 7.787, %v2106_v60  ;;  %v487_v59 = vmul.f32 7.787, %v2108_v19  ;;  %v2206_v10 = vadd.f32 0.5, %v411_v9  ;;  %v2942_v36 = vld [vmem:[#allocation28_spill] sm:$0xff] }
  0x9f   :  { %1381 = vst [vmem:[#allocation10 + $0x4] sm:$0x1] %v1362_v28  ;;  %v2208_v5 = vadd.f32 0.5, %v412_v7  ;;  %v1155_v57 = vadd.f32 %v1154_v37, %v1153_v44  ;;  %vm477_vm12 = vcmp.gt.f32.partialorder %v2099_v27, 0.008856 }
  0xa0   :  { %1382 = vst [vmem:[#allocation10 + $0x5] sm:$0x1] %v1363_v45  ;;  %v505_v11 = vmax.f32 %v2200_v35, 0.008856  ;;  %v506_v38 = vmax.f32 %v2202_v43, 0.008856 }
  0xa1   :  { %v488_v15 = vmul.f32 7.787, %v2144_v29  ;;  %v507_v13 = vmax.f32 %v2206_v10, 0.008856  ;;  %v508_v21 = vmax.f32 %v2208_v5, 0.008856  ;;  %v1360_v23 = vadd.f32 %v1341_v53, %v1155_v57 }
  0xa2   :  { %vm478_vm13 = vcmp.gt.f32.partialorder %v2106_v60, 0.008856  ;;  %v493_v16 = vadd.f32 0.137931, %v485_v25  ;;  %1526 = vlog2.f32 %v505_v11  ;;  %v494_v8 = vadd.f32 0.137931, %v486_v63 }
  0xa3   :  { %v495_v39 = vadd.f32 0.137931, %v487_v59  ;;  %1528 = vlog2.f32 %v506_v38  ;;  %v381_v30 = vmul.f32 0.0088789575, %v1898_v34  ;;  %1379 = vst [vmem:[#allocation10 + $0x2] sm:$0x1] %v1360_v23 }
  0xa4   :  { %1530 = vlog2.f32 %v507_v13  ;;  %v382_v26 = vmul.f32 0.0088789575, %v1909_v40  ;;  %v383_v61 = vmul.f32 0.0088789575, %v1911_v41  ;;  %v389_v55 = vmul.f32 0.05473826, %v2936_v47  ;;  %v1519_v42 = vpop.eup %1518 }
  0xa5   :  { %vm479_vm14 = vcmp.gt.f32.partialorder %v2108_v19, 0.008856  ;;  %v496_v33 = vadd.f32 0.137931, %v488_v15  ;;  %1532 = vlog2.f32 %v508_v21  ;;  %v384_v46 = vmul.f32 0.0088789575, %v2937_v52  ;;  %v1521_v58 = vpop.eup %1520 }
  0xa6   :  { %vm480_vm15 = vcmp.gt.f32.partialorder %v2144_v29, 0.008856  ;;  %v501_v34 = vsel %vm477_vm12, %v1519_v42, %v493_v16  ;;  %v390_v12 = vmul.f32 0.05473826, %v2938_v48  ;;  %v391_v40 = vmul.f32 0.05473826, %v1922_v49  ;;  %v1523_v41 = vpop.eup %1522 }
  0xa7   :  { %v502_v20 = vsel %vm478_vm13, %v1521_v58, %v494_v8  ;;  %v1143_v19 = vmul.f32 %v1983_v18, %v501_v34  ;;  %v392_v32 = vmul.f32 0.05473826, %v2939_v14  ;;  %v397_v50 = vadd.f32 %v389_v55, %v381_v30  ;;  %v1525_v54 = vpop.eup %1524  ;;  %v2940_v49 = vld [vmem:[#allocation26_spill] sm:$0xff]  ;;  %v2259_v14 = vld [vmem:[#allocation5 + $0x20] sm:$0xff] }
  0xa8   :  { %v503_v17 = vsel %vm479_vm14, %v1523_v41, %v495_v39  ;;  %v1144_v29 = vmul.f32 %v1987_v22, %v502_v20  ;;  %v398_v1 = vadd.f32 %v390_v12, %v382_v26  ;;  %v399_v27 = vadd.f32 %v391_v40, %v383_v61  ;;  %v2253_v12 = vld [vmem:[#allocation5 + $0x8] sm:$0xff]  ;;  %v2255_v40 = vld [vmem:[#allocation5 + $0x10] sm:$0xff]  ;;  %2947 = vst [vmem:[#allocation18_spill] sm:$0xff] %v2259_v14 }
  0xa9   :  { %v504_v24 = vsel %vm480_vm15, %v1525_v54, %v496_v33  ;;  %v1145_v6 = vmul.f32 %v2023_v56, %v503_v17  ;;  %v400_v2 = vadd.f32 %v392_v32, %v384_v46  ;;  %v405_v31 = vmul.f32 0.43638277, %v2940_v49  ;;  %v2251_v46 = vld [vmem:[#allocation5] sm:$0xff]  ;;  %2944 = vst [vmem:[#allocation15_spill] sm:$0xff] %v2253_v12  ;;  %2945 = vst [vmem:[#allocation16_spill] sm:$0xff] %v2255_v40  ;;  %v2261_v54 = vld [vmem:[#allocation5 + $0x28] sm:$0xff] }
  0xaa   :  { %v1146_v60 = vmul.f32 %v2027_v0, %v504_v24  ;;  %v1156_v3 = vadd.f32 %v1144_v29, %v1143_v19  ;;  %v406_v44 = vmul.f32 0.43638277, %v2941_v62  ;;  %v407_v4 = vmul.f32 0.43638277, %v2942_v36  ;;  %v2257_v19 = vld [vmem:[#allocation5 + $0x18] sm:$0xff]  ;;  %2948 = vst [vmem:[#allocation19_spill] sm:$0xff] %v2261_v54 }
  0xab   :  { %v408_v25 = vmul.f32 0.43638277, %v2943_v51  ;;  %v413_v28 = vadd.f32 %v405_v31, %v397_v50  ;;  %2946 = vst [vmem:[#allocation17_spill] sm:$0xff] %v2257_v19  ;;  %v2263_v17 = vld [vmem:[#allocation5 + $0x30] sm:$0xff]  ;;  %v2265_v29 = vld [vmem:[#allocation5 + $0x38] sm:$0xff] }
  0xac   :  { %v1157_v9 = vadd.f32 %v1156_v3, %v1145_v6  ;;  %v414_v7 = vadd.f32 %v406_v44, %v398_v1  ;;  %v415_v37 = vadd.f32 %v407_v4, %v399_v27  ;;  %2949 = vst [vmem:[#allocation20_spill] sm:$0xff] %v2263_v17  ;;  %2950 = vst [vmem:[#allocation21_spill] sm:$0xff] %v2265_v29  ;;  %v1342_v1 = vld [vmem:[#allocation10 + $0x3] sm:$0x1]  ;;  %v561_v24 = vmul.f32 7.787, %v2200_v35 }
  0xad   :  { %v416_v53 = vadd.f32 %v408_v25, %v400_v2  ;;  %v2239_v45 = vadd.f32 0.5, %v413_v28  ;;  %v2268_v6 = vld [vmem:[#allocation5 + $0x40] sm:$0xff]  ;;  %v2270_v2 = vld [vmem:[#allocation5 + $0x48] sm:$0xff]  ;;  %v562_v31 = vmul.f32 7.787, %v2202_v43  ;;  %v2277_v62 = vld [vmem:[#allocation5 + $0x58] sm:$0xff] }
  0xae   :  { %v1158_v63 = vadd.f32 %v1157_v9, %v1146_v60  ;;  %v2241_v59 = vadd.f32 0.5, %v414_v7  ;;  %v2243_v57 = vadd.f32 0.5, %v415_v37  ;;  %2951 = vst [vmem:[#allocation22_spill] sm:$0xff] %v2268_v6  ;;  %2952 = vst [vmem:[#allocation23_spill] sm:$0xff] %v2270_v2  ;;  %v2273_v60 = vld [vmem:[#allocation5 + $0x50] sm:$0xff] }
  0xaf   :  { %v1527_v11 = vpop.eup %1526  ;;  %v2245_v38 = vadd.f32 0.5, %v416_v53  ;;  %v509_v15 = vmax.f32 %v2239_v45, 0.008856  ;;  %v745_v3 = vmul.f32 0.1063355, %v2251_v46 }
  0xb0   :  { %v1529_v13 = vpop.eup %1528  ;;  %v1159_v21 = vrot.slane %v1158_v63, 4  ;;  %v514_v23 = vmul.f32 0.6931472, %v1527_v11  ;;  %v510_v16 = vmax.f32 %v2241_v59, 0.008856 }
  0xb1   :  { %v1531_v8 = vpop.eup %1530  ;;  %v516_v39 = vmul.f32 0.6931472, %v1529_v13  ;;  %v511_v30 = vmax.f32 %v2243_v57, 0.008856  ;;  %v512_v26 = vmax.f32 %v2245_v38, 0.008856  ;;  %1534 = vlog2.f32 %v509_v15 }
  0xb2   :  { %v1533_v61 = vpop.eup %1532  ;;  %v1160_v47 = vadd.f32 %v1159_v21, %v1158_v63  ;;  %v518_v55 = vmul.f32 0.6931472, %v1531_v8  ;;  %v529_v42 = vmul.f32 0.33333334, %v514_v23  ;;  %1536 = vlog2.f32 %v510_v16 }
  0xb3   :  { %v520_v33 = vmul.f32 0.6931472, %v1533_v61  ;;  %v530_v52 = vmul.f32 0.33333334, %v516_v39  ;;  %1538 = vlog2.f32 %v511_v30  ;;  %vm553_vm0 = vcmp.gt.f32.partialorder %v2200_v35, 0.008856 }
  0xb4   :  { %v1161_v58 = vrot.slane %v1160_v47, 2  ;;  %v531_v34 = vmul.f32 0.33333334, %v518_v55  ;;  %v537_v48 = vmul.f32 1.442695, %v529_v42  ;;  %1540 = vlog2.f32 %v512_v26 }
  0xb5   :  { %v532_v41 = vmul.f32 0.33333334, %v520_v33  ;;  %v539_v20 = vmul.f32 1.442695, %v530_v52  ;;  %v746_v44 = vmul.f32 0.1063355, %v2253_v12 }
  0xb6   :  { %v1162_v32 = vadd.f32 %v1161_v58, %v1160_v47  ;;  %1542 = vpow2.f32 %v537_v48  ;;  %v541_v50 = vmul.f32 1.442695, %v531_v34  ;;  %v747_v36 = vmul.f32 0.1063355, %v2255_v40 }
  0xb7   :  { %1544 = vpow2.f32 %v539_v20  ;;  %v543_v27 = vmul.f32 1.442695, %v532_v41  ;;  %v748_v4 = vmul.f32 0.1063355, %v2257_v19  ;;  %vm554_vm1 = vcmp.gt.f32.partialorder %v2202_v43, 0.008856 }
  0xb8   :  { %v1163_v49 = vrot.slane %v1162_v32, 1  ;;  %1546 = vpow2.f32 %v541_v50  ;;  %v563_v25 = vmul.f32 7.787, %v2206_v10  ;;  %v564_v28 = vmul.f32 7.787, %v2208_v5 }
  0xb9   :  { %1548 = vpow2.f32 %v543_v27  ;;  %v753_v9 = vmul.f32 0.35758, %v2259_v14  ;;  %v754_v7 = vmul.f32 0.35758, %v2261_v54  ;;  %v755_v37 = vmul.f32 0.35758, %v2263_v17 }
  0xba   :  { %v1164_v51 = vadd.f32 %v1163_v49, %v1162_v32  ;;  %v756_v53 = vmul.f32 0.35758, %v2265_v29  ;;  %v769_v15 = vmul.f32 0.0360845, %v2268_v6  ;;  %v770_v13 = vmul.f32 0.0360845, %v2270_v2 }
  0xbb   :  { %v761_v11 = vadd.f32 %v753_v9, %v745_v3  ;;  %v762_v21 = vadd.f32 %v754_v7, %v746_v44  ;;  %v763_v23 = vadd.f32 %v755_v37, %v747_v36  ;;  %v771_v8 = vmul.f32 0.0360845, %v2273_v60 }
  0xbc   :  { %v1361_v63 = vadd.f32 %v1342_v1, %v1164_v51  ;;  %v764_v16 = vadd.f32 %v756_v53, %v748_v4  ;;  %vm555_vm2 = vcmp.gt.f32.partialorder %v2206_v10, 0.008856  ;;  %vm556_vm3 = vcmp.gt.f32.partialorder %v2208_v5, 0.008856 }
  0xbd   :  { %v772_v30 = vmul.f32 0.0360845, %v2277_v62  ;;  %v777_v26 = vadd.f32 %v769_v15, %v761_v11  ;;  %v569_v47 = vadd.f32 0.137931, %v561_v24  ;;  %v778_v42 = vadd.f32 %v770_v13, %v762_v21 }
  0xbe   :  { %v1535_v39 = vpop.eup %1534  ;;  %1380 = vst [vmem:[#allocation10 + $0x3] sm:$0x1] %v1361_v63  ;;  %v779_v33 = vadd.f32 %v771_v8, %v763_v23  ;;  %v570_v58 = vadd.f32 0.137931, %v562_v31  ;;  %v571_v34 = vadd.f32 0.137931, %v563_v25 }
  0xbf   :  { %v1537_v61 = vpop.eup %1536  ;;  %v522_v55 = vmul.f32 0.6931472, %v1535_v39  ;;  %v780_v41 = vadd.f32 %v772_v30, %v764_v16  ;;  %v572_v32 = vadd.f32 0.137931, %v564_v28  ;;  %v2295_v3 = vadd.f32 0.5, %v777_v26  ;;  %v2318_v30 = vld [vmem:[#allocation5 + $0x60] sm:$0xff] }
  0xc0   :  { %v1539_v52 = vpop.eup %1538  ;;  %v524_v48 = vmul.f32 0.6931472, %v1537_v61  ;;  %v2297_v24 = vadd.f32 0.5, %v778_v42  ;;  %v2299_v51 = vadd.f32 0.5, %v779_v33  ;;  %v565_v43 = vmul.f32 7.787, %v2239_v45 }
  0xc1   :  { %v1541_v20 = vpop.eup %1540  ;;  %v526_v50 = vmul.f32 0.6931472, %v1539_v52  ;;  %v533_v1 = vmul.f32 0.33333334, %v522_v55  ;;  %v2303_v28 = vadd.f32 0.5, %v780_v41  ;;  %v2320_v26 = vld [vmem:[#allocation5 + $0x68] sm:$0xff] }
  0xc2   :  { %v528_v27 = vmul.f32 0.6931472, %v1541_v20  ;;  %v534_v49 = vmul.f32 0.33333334, %v524_v48  ;;  %vm557_vm4 = vcmp.gt.f32.partialorder %v2239_v45, 0.008856 }
  0xc3   :  { %v1543_v44 = vpop.eup %1542  ;;  %v535_v36 = vmul.f32 0.33333334, %v526_v50  ;;  %v545_v4 = vmul.f32 1.442695, %v533_v1  ;;  %v566_v10 = vmul.f32 7.787, %v2241_v59 }
  0xc4   :  { %v1545_v9 = vpop.eup %1544  ;;  %v577_v31 = vsel %vm553_vm0, %v1543_v44, %v569_v47  ;;  %v536_v25 = vmul.f32 0.33333334, %v528_v27  ;;  %v547_v7 = vmul.f32 1.442695, %v534_v49  ;;  %v2322_v61 = vld [vmem:[#allocation5 + $0x70] sm:$0xff]  ;;  %v2327_v42 = vld [vmem:[#allocation5 + $0x78] sm:$0xff] }
  0xc5   :  { %v1547_v37 = vpop.eup %1546  ;;  %v578_v53 = vsel %vm554_vm1, %v1545_v9, %v570_v58  ;;  %v1191_v63 = vmul.f32 %v1983_v18, %v577_v31  ;;  %1550 = vpow2.f32 %v545_v4  ;;  %v549_v11 = vmul.f32 1.442695, %v535_v36  ;;  %v2331_v58 = vld [vmem:[#allocation8] sm:$0xff]   ;;  %v2334_v48 = vld [vmem:[#allocation5 + $0x80] sm:$0xff]  ;;  %v2336_v41 = vld [vmem:[#allocation5 + $0x88] sm:$0xff] }
  0xc6   :  { %v1549_v15 = vpop.eup %1548  ;;  %v579_v13 = vsel %vm555_vm2, %v1547_v37, %v571_v34  ;;  %v1192_v21 = vmul.f32 %v1987_v22, %v578_v53  ;;  %1552 = vpow2.f32 %v547_v7  ;;  %v551_v35 = vmul.f32 1.442695, %v536_v25  ;;  %2953 = vst [vmem:[#allocation24_spill] sm:$0xff] %v2336_v41  ;;  %v2338_v20 = vld [vmem:[#allocation5 + $0x90] sm:$0xff]  ;;  %v2343_v50 = vld [vmem:[#allocation5 + $0x98] sm:$0xff]  ;;  %v2345_v1 = vld [vmem:[#allocation5 + $0xa0] sm:$0xff] }
  0xc7   :  { %v580_v23 = vsel %vm556_vm3, %v1549_v15, %v572_v32  ;;  %v1193_v16 = vmul.f32 %v2023_v56, %v579_v13  ;;  %1554 = vpow2.f32 %v549_v11  ;;  %v1009_v5 = vmax.f32 %v2295_v3, 0.008856  ;;  %2954 = vst [vmem:[#allocation25_spill] sm:$0xff] %v2338_v20  ;;  %2955 = vst [vmem:[#allocation26_spill] sm:$0xff] %v2343_v50  ;;  %v2347_v36 = vld [vmem:[#allocation5 + $0xa8] sm:$0xff]  ;;  %v2349_v4 = vld [vmem:[#allocation5 + $0xb0] sm:$0xff] }
  0xc8   :  { %v1194_v8 = vmul.f32 %v2027_v0, %v580_v23  ;;  %v1199_v39 = vadd.f32 %v1192_v21, %v1191_v63  ;;  %1556 = vpow2.f32 %v551_v35  ;;  %v1010_v47 = vmax.f32 %v2297_v24, 0.008856  ;;  %2956 = vst [vmem:[#allocation27_spill] sm:$0xff] %v2345_v1  ;;  %2957 = vst [vmem:[#allocation28_spill] sm:$0xff] %v2347_v36  ;;  %v2354_v53 = vld [vmem:[#allocation5 + $0xb8] sm:$0xff] }
  0xc9   :  { %v1011_v55 = vmax.f32 %v2299_v51, 0.008856  ;;  %vm558_vm5 = vcmp.gt.f32.partialorder %v2241_v59, 0.008856  ;;  %v567_v52 = vmul.f32 7.787, %v2243_v57  ;;  %1558 = vlog2.f32 %v1009_v5 }
  0xca   :  { %v1200_v33 = vadd.f32 %v1199_v39, %v1193_v16  ;;  %v1012_v34 = vmax.f32 %v2303_v28, 0.008856  ;;  %vm559_vm6 = vcmp.gt.f32.partialorder %v2243_v57, 0.008856  ;;  %vm560_vm7 = vcmp.gt.f32.partialorder %v2245_v38, 0.008856 }
  0xcb   :  { %v568_v32 = vmul.f32 7.787, %v2245_v38  ;;  %v573_v49 = vadd.f32 0.137931, %v565_v43  ;;  %v574_v44 = vadd.f32 0.137931, %v566_v10  ;;  %1560 = vlog2.f32 %v1010_v47 }
  0xcc   :  { %v1201_v27 = vadd.f32 %v1200_v33, %v1194_v8  ;;  %2958 = vst [vmem:[#allocation29_spill] sm:$0xff] %v2349_v4  ;;  %1562 = vlog2.f32 %v1011_v55  ;;  %v749_v9 = vmul.f32 0.1063355, %v2318_v30  ;;  %v750_v31 = vmul.f32 0.1063355, %v2320_v26  ;;  %2959 = vst [vmem:[#allocation34_spill] sm:$0xff] %v2354_v53 }
  0xcd   :  { %v751_v25 = vmul.f32 0.1063355, %v2322_v61  ;;  %v575_v37 = vadd.f32 0.137931, %v567_v52  ;;  %1564 = vlog2.f32 %v1012_v34  ;;  %v752_v63 = vmul.f32 0.1063355, %v2327_v42 }
  0xce   :  { %v1202_v7 = vrot.slane %v1201_v27, 4  ;;  %v2358_v11 = vunpack.c.l.bf16 %v2331_v58  ;;  %v757_v15 = vmul.f32 0.35758, %v2334_v48  ;;  %v758_v13 = vmul.f32 0.35758, %v2336_v41 }
  0xcf   :  { %v759_v21 = vmul.f32 0.35758, %v2338_v20  ;;  %v760_v23 = vmul.f32 0.35758, %v2343_v50  ;;  %v773_v16 = vmul.f32 0.0360845, %v2345_v1 }
  0xd0   :  { %v1203_v35 = vadd.f32 %v1202_v7, %v1201_v27  ;;  %v774_v43 = vmul.f32 0.0360845, %v2347_v36  ;;  %v765_v8 = vadd.f32 %v757_v15, %v749_v9  ;;  %v766_v39 = vadd.f32 %v758_v13, %v750_v31 }
  0xd1   :  { %v767_v10 = vadd.f32 %v759_v21, %v751_v25  ;;  %v775_v5 = vmul.f32 0.0360845, %v2349_v4  ;;  %v576_v33 = vadd.f32 0.137931, %v568_v32  ;;  %v768_v52 = vadd.f32 %v760_v23, %v752_v63 }
  0xd2   :  { %v1551_v47 = vpop.eup %1550  ;;  %v1204_v55 = vrot.slane %v1203_v35, 2  ;;  %v776_v34 = vmul.f32 0.0360845, %v2354_v53  ;;  %v781_v7 = vadd.f32 %v773_v16, %v765_v8  ;;  %v782_v50 = vadd.f32 %v774_v43, %v766_v39 }
  0xd3   :  { %v1553_v41 = vpop.eup %1552  ;;  %v581_v27 = vsel %vm557_vm4, %v1551_v47, %v573_v49  ;;  %v783_v1 = vadd.f32 %v775_v5, %v767_v10  ;;  %v1057_v57 = vmul.f32 7.787, %v2295_v3  ;;  %v1059_v43 = vmul.f32 7.787, %v2299_v51 }
  0xd4   :  { %v1555_v20 = vpop.eup %1554  ;;  %v1205_v36 = vadd.f32 %v1204_v55, %v1203_v35  ;;  %v582_v9 = vsel %vm558_vm5, %v1553_v41, %v574_v44  ;;  %v1195_v31 = vmul.f32 %v1983_v18, %v581_v27  ;;  %v784_v25 = vadd.f32 %v776_v34, %v768_v52  ;;  %v1345_v44 = vld [vmem:[#allocation10 + $0x6] sm:$0x1] }
  0xd5   :  { %v1557_v15 = vpop.eup %1556  ;;  %v583_v32 = vsel %vm559_vm6, %v1555_v20, %v575_v37  ;;  %v1196_v63 = vmul.f32 %v1987_v22, %v582_v9  ;;  %v2376_v13 = vadd.f32 0.5, %v781_v7  ;;  %v2378_v45 = vadd.f32 0.5, %v782_v50 }
  0xd6   :  { %v1206_v49 = vrot.slane %v1205_v36, 1  ;;  %v584_v21 = vsel %vm560_vm7, %v1557_v15, %v576_v33  ;;  %v1197_v59 = vmul.f32 %v2023_v56, %v583_v32  ;;  %v2383_v41 = vadd.f32 0.5, %v783_v1  ;;  %v1559_v37 = vpop.eup %1558 }
  0xd7   :  { %v1198_v35 = vmul.f32 %v2027_v0, %v584_v21  ;;  %v1208_v23 = vadd.f32 %v1196_v63, %v1195_v31  ;;  %v2387_v20 = vadd.f32 0.5, %v784_v25  ;;  %v1058_v50 = vmul.f32 7.787, %v2297_v24 }
  0xd8   :  { %v1207_v16 = vadd.f32 %v1206_v49, %v1205_v36  ;;  %v1013_v38 = vmax.f32 %v2376_v13, 0.008856  ;;  %v1561_v8 = vpop.eup %1560  ;;  %v1018_v1 = vmul.f32 0.6931472, %v1559_v37  ;;  %v1060_v10 = vmul.f32 7.787, %v2303_v28 }
  0xd9   :  { %v1209_v39 = vadd.f32 %v1208_v23, %v1197_v59  ;;  %v1014_v5 = vmax.f32 %v2378_v45, 0.008856  ;;  %v1563_v47 = vpop.eup %1562  ;;  %v1020_v33 = vmul.f32 0.6931472, %v1561_v8  ;;  %v1015_v52 = vmax.f32 %v2383_v41, 0.008856 }
  0xda   :  { %v1364_v55 = vadd.f32 %v1345_v44, %v1207_v16  ;;  %v1016_v36 = vmax.f32 %v2387_v20, 0.008856  ;;  %v1565_v34 = vpop.eup %1564  ;;  %v1022_v7 = vmul.f32 0.6931472, %v1563_v47  ;;  %v1033_v9 = vmul.f32 0.33333334, %v1018_v1 }
  0xdb   :  { %v1210_v27 = vadd.f32 %v1209_v39, %v1198_v35  ;;  %1566 = vlog2.f32 %v1013_v38  ;;  %v1024_v31 = vmul.f32 0.6931472, %v1565_v34  ;;  %v1034_v25 = vmul.f32 0.33333334, %v1020_v33  ;;  %v1448_v1 = vld [vmem:[#allocation8 + $0x8] sm:$0xff]  }
  0xdc   :  { %1383 = vst [vmem:[#allocation10 + $0x6] sm:$0x1] %v1364_v55  ;;  %v2397_v15 = vmul.f32 903.3, %v2295_v3  ;;  %1568 = vlog2.f32 %v1014_v5  ;;  %v1035_v63 = vmul.f32 0.33333334, %v1022_v7  ;;  %v2428_v34 = vunpack.c.h.bf16 %v2331_v58 }
  0xdd   :  { %v1211_v32 = vrot.slane %v1210_v27, 4  ;;  %v1041_v49 = vmul.f32 1.442695, %v1033_v9  ;;  %1570 = vlog2.f32 %v1015_v52  ;;  %v1036_v21 = vmul.f32 0.33333334, %v1024_v31 }
  0xde   :  { %v1043_v59 = vmul.f32 1.442695, %v1034_v25  ;;  %v2399_v44 = vadd.f32 0.137931, %v1057_v57  ;;  %1572 = vlog2.f32 %v1016_v36  ;;  %v1045_v23 = vmul.f32 1.442695, %v1035_v63 }
  0xdf   :  { %v1212_v35 = vadd.f32 %v1211_v32, %v1210_v27  ;;  %1574 = vpow2.f32 %v1041_v49  ;;  %v2401_v37 = vadd.f32 0.137931, %v1058_v50  ;;  %v1047_v16 = vmul.f32 1.442695, %v1036_v21  ;;  %v1346_v36 = vld [vmem:[#allocation10 + $0x7] sm:$0x1] }
  0xe0   :  { %1576 = vpow2.f32 %v1043_v59  ;;  %v2403_v38 = vadd.f32 0.137931, %v1059_v43  ;;  %v2405_v8 = vadd.f32 0.137931, %v1060_v10  ;;  %v2408_v5 = vmul.f32 903.3, %v2297_v24 }
  0xe1   :  { %v1213_v39 = vrot.slane %v1212_v35, 2  ;;  %1578 = vpow2.f32 %v1045_v23  ;;  %v2411_v57 = vmul.f32 903.3, %v2299_v51  ;;  %vm1001_vm8 = vcmp.gt.f32.partialorder %v2295_v3, 0.008856 }
  0xe2   :  { %1580 = vpow2.f32 %v1047_v16  ;;  %v2415_v50 = vmul.f32 903.3, %v2303_v28  ;;  %v1061_v43 = vmul.f32 7.787, %v2376_v13  ;;  %v697_v10 = vmul.f32 0.21697637, %v2251_v46 }
  0xe3   :  { %v1214_v47 = vadd.f32 %v1213_v39, %v1212_v35  ;;  %vm1002_vm9 = vcmp.gt.f32.partialorder %v2297_v24, 0.008856  ;;  %v2421_v55 = vmul.f32 7.787, %v2378_v45  ;;  %v2424_v33 = vmul.f32 7.787, %v2383_v41 }
  0xe4   :  { %v698_v52 = vmul.f32 0.21697637, %v2253_v12  ;;  %vm1003_vm10 = vcmp.gt.f32.partialorder %v2299_v51, 0.008856  ;;  %v699_v27 = vmul.f32 0.21697637, %v2255_v40  ;;  %v2434_v25 = vunpack.c.l.bf16 %v1448_v1 }
  0xe5   :  { %v700_v7 = vmul.f32 0.21697637, %v2257_v19  ;;  %v705_v9 = vmul.f32 0.18810971, %v2259_v14  ;;  %v1215_v31 = vrot.slane %v1214_v47, 1 }
  0xe6   :  { %vm1004_vm11 = vcmp.gt.f32.partialorder %v2303_v28, 0.008856  ;;  %v706_v32 = vmul.f32 0.18810971, %v2261_v54  ;;  %v707_v63 = vmul.f32 0.18810971, %v2263_v17 }
  0xe7   :  { %v708_v58 = vmul.f32 0.18810971, %v2265_v29  ;;  %v713_v49 = vadd.f32 %v705_v9, %v697_v10  ;;  %v721_v21 = vmul.f32 0.094913915, %v2268_v6  ;;  %v722_v59 = vmul.f32 0.094913915, %v2270_v2 }
  0xe8   :  { %v1216_v35 = vadd.f32 %v1215_v31, %v1214_v47  ;;  %v714_v23 = vadd.f32 %v706_v32, %v698_v52  ;;  %v715_v16 = vadd.f32 %v707_v63, %v699_v27  ;;  %v723_v39 = vmul.f32 0.094913915, %v2273_v60  ;;  %v1567_v0 = vpop.eup %1566 }
  0xe9   :  { %v2444_v14 = vmul.f32 7.787, %v2387_v20  ;;  %v716_v19 = vadd.f32 %v708_v58, %v700_v7  ;;  %v724_v54 = vmul.f32 0.094913915, %v2277_v62  ;;  %v729_v17 = vadd.f32 %v721_v21, %v713_v49  ;;  %v1569_v40 = vpop.eup %1568 }
  0xea   :  { %v1365_v29 = vadd.f32 %v1346_v36, %v1216_v35  ;;  %v1026_v10 = vmul.f32 0.6931472, %v1567_v0  ;;  %v730_v9 = vadd.f32 %v722_v59, %v714_v23  ;;  %v731_v6 = vadd.f32 %v723_v39, %v715_v16  ;;  %v1571_v12 = vpop.eup %1570 }
  0xeb   :  { %v1028_v2 = vmul.f32 0.6931472, %v1569_v40  ;;  %v2447_v47 = vadd.f32 0.137931, %v1061_v43  ;;  %v732_v52 = vadd.f32 %v724_v54, %v716_v19  ;;  %v2449_v27 = vadd.f32 0.5, %v729_v17  ;;  %v1573_v31 = vpop.eup %1572 }
  0xec   :  { %1384 = vst [vmem:[#allocation10 + $0x7] sm:$0x1] %v1365_v29  ;;  %v2451_v32 = vunpack.c.h.bf16 %v1448_v1  ;;  %v1030_v7 = vmul.f32 0.6931472, %v1571_v12  ;;  %v1037_v63 = vmul.f32 0.33333334, %v1026_v10  ;;  %v1575_v49 = vpop.eup %1574 }
  0xed   :  { %v2453_v58 = vadd.f32 0.5, %v730_v9  ;;  %v1032_v36 = vmul.f32 0.6931472, %v1573_v31  ;;  %v1038_v0 = vmul.f32 0.33333334, %v1028_v2  ;;  %v2455_v21 = vadd.f32 0.5, %v731_v6  ;;  %v1577_v40 = vpop.eup %1576 }
  0xee   :  { %v2457_v59 = vadd.f32 0.5, %v732_v52  ;;  %v2462_v19 = vsel %vm1001_vm8, %v1575_v49, %v2399_v44  ;;  %v1039_v54 = vmul.f32 0.33333334, %v1030_v7  ;;  %v1049_v17 = vmul.f32 1.442695, %v1037_v63  ;;  %v1579_v29 = vpop.eup %1578 }
  0xef   :  { %v841_v12 = vmax.f32 %v2449_v27, 0.008856  ;;  %v2468_v1 = vsel %vm1002_vm9, %v1577_v40, %v2401_v37  ;;  %v1081_v6 = vmul.f32 116.0, %v2462_v19  ;;  %v1040_v2 = vmul.f32 0.33333334, %v1032_v36  ;;  %v1581_v35 = vpop.eup %1580 }
  0xf0   :  { %v1051_v43 = vmul.f32 1.442695, %v1038_v0  ;;  %v2474_v44 = vsel %vm1003_vm10, %v1579_v29, %v2403_v38  ;;  %v1082_v23 = vmul.f32 116.0, %v2468_v1  ;;  %1582 = vpow2.f32 %v1049_v17 }
  0xf1   :  { %v1053_v16 = vmul.f32 1.442695, %v1039_v54  ;;  %v2480_v39 = vsel %vm1004_vm11, %v1581_v35, %v2405_v8  ;;  %v1083_v37 = vmul.f32 116.0, %v2474_v44  ;;  %v1423_v10 = vadd.f32 -16.0, %v1081_v6 }
  0xf2   :  { %1584 = vpow2.f32 %v1051_v43  ;;  %v1084_v9 = vmul.f32 116.0, %v2480_v39  ;;  %v1424_v52 = vadd.f32 -16.0, %v1082_v23  ;;  %v1055_v31 = vmul.f32 1.442695, %v1040_v2 }
  0xf3   :  { %1586 = vpow2.f32 %v1053_v16  ;;  %v1425_v38 = vadd.f32 -16.0, %v1083_v37  ;;  %v1105_v7 = vsel %vm1001_vm8, %v1423_v10, %v2397_v15  ;;  %vm1005_vm12 = vcmp.gt.f32.partialorder %v2376_v13, 0.008856 }
  0xf4   :  { %v842_v63 = vmax.f32 %v2453_v58, 0.008856  ;;  %v843_v8 = vmax.f32 %v2455_v21, 0.008856  ;;  %v1426_v49 = vadd.f32 -16.0, %v1084_v9  ;;  %v1106_v36 = vsel %vm1002_vm9, %v1424_v52, %v2408_v5  ;;  %v2961_v9 = vld [vmem:[#allocation24_spill] sm:$0xff] }
  0xf5   :  { %v1217_v0 = vmul.f32 %v2358_v11, %v1105_v7  ;;  %vm1006_vm13 = vcmp.gt.f32.partialorder %v2378_v45, 0.008856  ;;  %1588 = vpow2.f32 %v1055_v31  ;;  %v1107_v3 = vsel %vm1003_vm10, %v1425_v38, %v2411_v57  ;;  %v2962_v31 = vld [vmem:[#allocation25_spill] sm:$0xff] }
  0xf6   :  { %v1218_v15 = vmul.f32 %v2428_v34, %v1106_v36  ;;  %vm1007_vm14 = vcmp.gt.f32.partialorder %v2383_v41, 0.008856  ;;  %v844_v40 = vmax.f32 %v2457_v59, 0.008856  ;;  %1590 = vlog2.f32 %v841_v12 }
  0xf7   :  { %v1108_v24 = vsel %vm1004_vm11, %v1426_v49, %v2415_v50  ;;  %v1219_v5 = vmul.f32 %v2434_v25, %v1107_v3  ;;  %v1070_v54 = vadd.f32 0.137931, %v2421_v55  ;;  %1592 = vlog2.f32 %v842_v63  ;;  %v2963_v49 = vld [vmem:[#allocation26_spill] sm:$0xff] }
  0xf8   :  { %v1220_v17 = vmul.f32 %v2451_v32, %v1108_v24  ;;  %v1225_v51 = vadd.f32 %v1218_v15, %v1217_v0  ;;  %vm1008_vm15 = vcmp.gt.f32.partialorder %v2387_v20, 0.008856  ;;  %1594 = vlog2.f32 %v843_v8  ;;  %v2964_v0 = vld [vmem:[#allocation27_spill] sm:$0xff] }
  0xf9   :  { %v1321_v57 = vadd.f32 %v1987_v22, %v1983_v18  ;;  %v1071_v12 = vadd.f32 0.137931, %v2424_v33  ;;  %v1072_v29 = vadd.f32 0.137931, %v2444_v14  ;;  %v1101_v28 = vmul.f32 903.3, %v2376_v13 }
  0xfa   :  { %1596 = vlog2.f32 %v844_v40  ;;  %v1226_v50 = vadd.f32 %v1225_v51, %v1219_v5  ;;  %v1102_v55 = vmul.f32 903.3, %v2378_v45  ;;  %v1103_v6 = vmul.f32 903.3, %v2383_v41 }
  0xfb   :  { %v2516_v2 = vmul.f32 903.3, %v2387_v20  ;;  %v701_v43 = vmul.f32 0.21697637, %v2318_v30  ;;  %v702_v35 = vmul.f32 0.21697637, %v2320_v26  ;;  %v2526_v37 = vadd.f32 %v2023_v56, %v1321_v57 }
  0xfc   :  { %v703_v23 = vmul.f32 0.21697637, %v2322_v61  ;;  %v1227_v33 = vadd.f32 %v1226_v50, %v1220_v17  ;;  %v2522_v14 = vmul.f32 7.787, %v2449_v27  ;;  %v704_v16 = vmul.f32 0.21697637, %v2327_v42 }
  0xfd   :  { %2960 = vst [vmem:[#allocation35_spill] sm:$0xff] %v2526_v37  ;;  %v709_v10 = vmul.f32 0.18810971, %v2334_v48  ;;  %v710_v52 = vmul.f32 0.18810971, %v2961_v9  ;;  %v2533_v7 = vmul.f32 %v2358_v11, %v2462_v19  ;;  %v1583_v63 = vpop.eup %1582  ;;  %v2539_v15 = vmul.f32 %v2428_v34, %v2468_v1 }
  0xfe   :  { %v711_v38 = vmul.f32 0.18810971, %v2962_v31  ;;  %v1228_v8 = vrot.slane %v1227_v33, 4  ;;  %v712_v36 = vmul.f32 0.18810971, %v2963_v49  ;;  %v2544_v24 = vsel %vm1005_vm12, %v1583_v63, %v2447_v47  ;;  %v2965_v47 = vld [vmem:[#allocation28_spill] sm:$0xff] }
  0xff   :  { %v725_v3 = vmul.f32 0.094913915, %v2964_v0  ;;  %v1585_v40 = vpop.eup %1584  ;;  %v717_v5 = vadd.f32 %v709_v10, %v701_v43  ;;  %v718_v17 = vadd.f32 %v710_v52, %v702_v35  ;;  %v1085_v56 = vmul.f32 116.0, %v2544_v24 }
 0x100   :  { %v719_v19 = vadd.f32 %v711_v38, %v703_v23  ;;  %v1587_v51 = vpop.eup %1586  ;;  %v1229_v57 = vadd.f32 %v1228_v8, %v1227_v33  ;;  %v2548_v50 = vsel %vm1006_vm13, %v1585_v40, %v1070_v54  ;;  %v720_v22 = vadd.f32 %v712_v36, %v704_v16 }
 0x101   :  { %v2553_v1 = vsel %vm1007_vm14, %v1587_v51, %v1071_v12  ;;  %v1086_v18 = vmul.f32 116.0, %v2548_v50  ;;  %v726_v63 = vmul.f32 0.094913915, %v2965_v47  ;;  %v727_v43 = vmul.f32 0.094913915, %v2349_v4 }
 0x102   :  { %v1589_v35 = vpop.eup %1588  ;;  %v1230_v23 = vrot.slane %v1229_v57, 2  ;;  %v1087_v33 = vmul.f32 116.0, %v2553_v1  ;;  %v1427_v10 = vadd.f32 -16.0, %v1085_v56  ;;  %v728_v54 = vmul.f32 0.094913915, %v2354_v53 }
 0x103   :  { %v1591_v52 = vpop.eup %1590  ;;  %v2562_v16 = vsel %vm1008_vm15, %v1589_v35, %v1072_v29  ;;  %v1428_v12 = vadd.f32 -16.0, %v1086_v18  ;;  %v733_v38 = vadd.f32 %v725_v3, %v717_v5  ;;  %v734_v8 = vadd.f32 %v726_v63, %v718_v17  ;;  %v1347_v3 = vld [vmem:[#allocation10 + $0x8] sm:$0x1] }
 0x104   :  { %v1593_v36 = vpop.eup %1592  ;;  %v1231_v40 = vadd.f32 %v1230_v23, %v1229_v57  ;;  %v1088_v51 = vmul.f32 116.0, %v2562_v16  ;;  %v1429_v4 = vadd.f32 -16.0, %v1087_v33  ;;  %v1109_v37 = vsel %vm1005_vm12, %v1427_v10, %v1101_v28 }
 0x105   :  { %v1595_v47 = vpop.eup %1594  ;;  %v1110_v56 = vsel %vm1006_vm13, %v1428_v12, %v1102_v55  ;;  %v1221_v53 = vmul.f32 %v2358_v11, %v1109_v37  ;;  %v850_v0 = vmul.f32 0.6931472, %v1591_v52  ;;  %v852_v29 = vmul.f32 0.6931472, %v1593_v36 }
 0x106   :  { %v1232_v18 = vrot.slane %v1231_v40, 1  ;;  %v1430_v5 = vadd.f32 -16.0, %v1088_v51  ;;  %v1111_v17 = vsel %vm1007_vm14, %v1429_v4, %v1103_v6  ;;  %v1222_v57 = vmul.f32 %v2428_v34, %v1110_v56 }
 0x107   :  { %v1597_v35 = vpop.eup %1596  ;;  %v1223_v13 = vmul.f32 %v2434_v25, %v1111_v17  ;;  %v854_v28 = vmul.f32 0.6931472, %v1595_v47  ;;  %v865_v23 = vmul.f32 0.33333334, %v850_v0  ;;  %v866_v33 = vmul.f32 0.33333334, %v852_v29 }
 0x108   :  { %v856_v63 = vmul.f32 0.6931472, %v1597_v35  ;;  %v1233_v45 = vadd.f32 %v1232_v18, %v1231_v40  ;;  %v1112_v55 = vsel %vm1008_vm15, %v1430_v5, %v2516_v2  ;;  %v1234_v37 = vadd.f32 %v1222_v57, %v1221_v53 }
 0x109   :  { %v1224_v10 = vmul.f32 %v2451_v32, %v1112_v55  ;;  %v867_v52 = vmul.f32 0.33333334, %v854_v28  ;;  %v873_v41 = vmul.f32 1.442695, %v865_v23  ;;  %v875_v36 = vmul.f32 1.442695, %v866_v33 }
 0x10a   :  { %v868_v12 = vmul.f32 0.33333334, %v856_v63  ;;  %v1366_v4 = vadd.f32 %v1347_v3, %v1233_v45  ;;  %v1235_v6 = vadd.f32 %v1234_v37, %v1223_v13  ;;  %v735_v51 = vadd.f32 %v727_v43, %v719_v19  ;;  %v1348_v55 = vld [vmem:[#allocation10 + $0x9] sm:$0x1] }
 0x10b   :  { %1598 = vpow2.f32 %v873_v41  ;;  %v877_v47 = vmul.f32 1.442695, %v867_v52  ;;  %v736_v0 = vadd.f32 %v728_v54, %v720_v22  ;;  %v2578_v20 = vadd.f32 0.5, %v733_v38  ;;  %v2966_v41 = vld [vmem:[#allocation15_spill] sm:$0xff] }
 0x10c   :  { %v879_v56 = vmul.f32 1.442695, %v868_v12  ;;  %1385 = vst [vmem:[#allocation10 + $0x8] sm:$0x1] %v1366_v4  ;;  %v1236_v40 = vadd.f32 %v1235_v6, %v1224_v10  ;;  %1600 = vpow2.f32 %v875_v36  ;;  %v2580_v53 = vadd.f32 0.5, %v734_v8  ;;  %v2967_v36 = vld [vmem:[#allocation16_spill] sm:$0xff] }
 0x10d   :  { %1602 = vpow2.f32 %v877_v47  ;;  %v898_v2 = vmul.f32 7.787, %v2453_v58  ;;  %v2583_v29 = vadd.f32 0.5, %v735_v51  ;;  %v2585_v35 = vadd.f32 0.5, %v736_v0  ;;  %v2968_v47 = vld [vmem:[#allocation17_spill] sm:$0xff] }
 0x10e   :  { %v1237_v18 = vrot.slane %v1236_v40, 4  ;;  %1604 = vpow2.f32 %v879_v56  ;;  %v845_v19 = vmax.f32 %v2578_v20, 0.008856  ;;  %v846_v22 = vmax.f32 %v2580_v53, 0.008856 }
 0x10f   :  { %v847_v43 = vmax.f32 %v2583_v29, 0.008856  ;;  %v848_v54 = vmax.f32 %v2585_v35, 0.008856  ;;  %v1271_v38 = vmul.f32 %v2434_v25, %v2474_v44  ;;  %v1277_v8 = vadd.f32 %v2539_v15, %v2533_v7 }
 0x110   :  { %v1238_v3 = vadd.f32 %v1237_v18, %v1236_v40  ;;  %v899_v5 = vmul.f32 7.787, %v2455_v21  ;;  %v900_v17 = vmul.f32 7.787, %v2457_v59  ;;  %1606 = vlog2.f32 %v845_v19  ;;  %v2970_v18 = vld [vmem:[#allocation19_spill] sm:$0xff]  ;;  %v2971_v19 = vld [vmem:[#allocation20_spill] sm:$0xff] }
 0x111   :  { %vm889_vm0 = vcmp.gt.f32.partialorder %v2449_v27, 0.008856  ;;  %vm890_vm1 = vcmp.gt.f32.partialorder %v2453_v58, 0.008856  ;;  %1608 = vlog2.f32 %v846_v22  ;;  %v1272_v57 = vmul.f32 %v2451_v32, %v2480_v39 }
 0x112   :  { %v1239_v13 = vrot.slane %v1238_v3, 2  ;;  %vm891_vm2 = vcmp.gt.f32.partialorder %v2455_v21, 0.008856  ;;  %vm892_vm3 = vcmp.gt.f32.partialorder %v2457_v59, 0.008856  ;;  %1610 = vlog2.f32 %v847_v43 }
 0x113   :  { %v905_v44 = vadd.f32 0.137931, %v2522_v14  ;;  %v906_v7 = vadd.f32 0.137931, %v898_v2  ;;  %1612 = vlog2.f32 %v848_v54  ;;  %v1278_v15 = vadd.f32 %v1277_v8, %v1271_v38  ;;  %v2972_v38 = vld [vmem:[#allocation21_spill] sm:$0xff] }
 0x114   :  { %v1240_v28 = vadd.f32 %v1239_v13, %v1238_v3  ;;  %v907_v63 = vadd.f32 0.137931, %v899_v5  ;;  %v908_v23 = vadd.f32 0.137931, %v900_v17  ;;  %v1273_v45 = vmul.f32 %v2358_v11, %v2544_v24 }
 0x115   :  { %v2607_v39 = vmul.f32 7.787, %v2578_v20  ;;  %v1279_v37 = vadd.f32 %v1278_v15, %v1272_v57  ;;  %v1274_v33 = vmul.f32 %v2428_v34, %v2548_v50  ;;  %v1275_v14 = vmul.f32 %v2434_v25, %v2553_v1  ;;  %v2969_v50 = vld [vmem:[#allocation18_spill] sm:$0xff] }
 0x116   :  { %v1241_v10 = vrot.slane %v1240_v28, 1  ;;  %v1276_v52 = vmul.f32 %v2451_v32, %v2562_v16  ;;  %v793_v12 = vmul.f32 0.0088789575, %v2251_v46  ;;  %v794_v4 = vmul.f32 0.0088789575, %v2966_v41 }
 0x117   :  { %v1280_v24 = vrot.slane %v1279_v37, 4  ;;  %v1286_v6 = vadd.f32 %v1274_v33, %v1273_v45  ;;  %v795_v51 = vmul.f32 0.0088789575, %v2967_v36  ;;  %v796_v56 = vmul.f32 0.0088789575, %v2968_v47 }
 0x118   :  { %v1599_v0 = vpop.eup %1598  ;;  %v1242_v40 = vadd.f32 %v1241_v10, %v1240_v28  ;;  %v801_v2 = vmul.f32 0.05473826, %v2969_v50  ;;  %v802_v1 = vmul.f32 0.05473826, %v2970_v18  ;;  %v803_v22 = vmul.f32 0.05473826, %v2971_v19 }
 0x119   :  { %v1601_v43 = vpop.eup %1600  ;;  %v913_v46 = vsel %vm889_vm0, %v1599_v0, %v905_v44  ;;  %v1281_v16 = vadd.f32 %v1280_v24, %v1279_v37  ;;  %v1287_v54 = vadd.f32 %v1286_v6, %v1275_v14  ;;  %v804_v8 = vmul.f32 0.05473826, %v2972_v38  ;;  %v2973_v6 = vld [vmem:[#allocation22_spill] sm:$0xff] }
 0x11a   :  { %v1603_v3 = vpop.eup %1602  ;;  %v1367_v5 = vadd.f32 %v1348_v55, %v1242_v40  ;;  %v914_v17 = vsel %vm890_vm1, %v1601_v43, %v906_v7  ;;  %v1243_v57 = vmul.f32 %v2358_v11, %v913_v46  ;;  %v809_v13 = vadd.f32 %v801_v2, %v793_v12  ;;  %v1351_v50 = vld [vmem:[#allocation10 + $0xc] sm:$0x1] }
 0x11b   :  { %v1605_v15 = vpop.eup %1604  ;;  %v915_v28 = vsel %vm891_vm2, %v1603_v3, %v907_v63  ;;  %v1244_v45 = vmul.f32 %v2428_v34, %v914_v17  ;;  %v1282_v27 = vrot.slane %v1281_v16, 2  ;;  %v1288_v44 = vadd.f32 %v1287_v54, %v1276_v52  ;;  %v2974_v52 = vld [vmem:[#allocation23_spill] sm:$0xff] }
 0x11c   :  { %1386 = vst [vmem:[#allocation10 + $0x9] sm:$0x1] %v1367_v5  ;;  %v916_v37 = vsel %vm892_vm3, %v1605_v15, %v908_v23  ;;  %v1245_v55 = vmul.f32 %v2434_v25, %v915_v28  ;;  %v810_v33 = vadd.f32 %v802_v1, %v794_v4  ;;  %v811_v58 = vadd.f32 %v803_v22, %v795_v51 }
 0x11d   :  { %v1607_v7 = vpop.eup %1606  ;;  %v1246_v14 = vmul.f32 %v2451_v32, %v916_v37  ;;  %v1251_v10 = vadd.f32 %v1244_v45, %v1243_v57  ;;  %v1283_v12 = vadd.f32 %v1282_v27, %v1281_v16  ;;  %v1289_v41 = vrot.slane %v1288_v44, 4 }
 0x11e   :  { %v1609_v21 = vpop.eup %1608  ;;  %v858_v63 = vmul.f32 0.6931472, %v1607_v7  ;;  %v812_v24 = vadd.f32 %v804_v8, %v796_v56  ;;  %v817_v36 = vmul.f32 0.43638277, %v2973_v6  ;;  %v818_v47 = vmul.f32 0.43638277, %v2974_v52 }
 0x11f   :  { %v1611_v0 = vpop.eup %1610  ;;  %v1252_v59 = vadd.f32 %v1251_v10, %v1245_v55  ;;  %v860_v23 = vmul.f32 0.6931472, %v1609_v21  ;;  %v1284_v40 = vrot.slane %v1283_v12, 1  ;;  %v1290_v4 = vadd.f32 %v1289_v41, %v1288_v44  ;;  %v1352_v7 = vld [vmem:[#allocation10 + $0xd] sm:$0x1] }
 0x120   :  { %v1613_v51 = vpop.eup %1612  ;;  %v862_v2 = vmul.f32 0.6931472, %v1611_v0  ;;  %v869_v18 = vmul.f32 0.33333334, %v858_v63  ;;  %v819_v1 = vmul.f32 0.43638277, %v2273_v60  ;;  %v825_v19 = vadd.f32 %v817_v36, %v809_v13 }
 0x121   :  { %v1253_v22 = vadd.f32 %v1252_v59, %v1246_v14  ;;  %v864_v43 = vmul.f32 0.6931472, %v1613_v51  ;;  %v870_v46 = vmul.f32 0.33333334, %v860_v23  ;;  %v1285_v56 = vadd.f32 %v1284_v40, %v1283_v12  ;;  %v1349_v36 = vld [vmem:[#allocation10 + $0xa] sm:$0x1] }
 0x122   :  { %v871_v16 = vmul.f32 0.33333334, %v862_v2  ;;  %v881_v54 = vmul.f32 1.442695, %v869_v18  ;;  %v1291_v38 = vrot.slane %v1290_v4, 2  ;;  %v826_v8 = vadd.f32 %v818_v47, %v810_v33 }
 0x123   :  { %v1254_v3 = vrot.slane %v1253_v22, 4  ;;  %v872_v5 = vmul.f32 0.33333334, %v864_v43  ;;  %v883_v17 = vmul.f32 1.442695, %v870_v46  ;;  %v1370_v57 = vadd.f32 %v1351_v50, %v1285_v56 }
 0x124   :  { %1614 = vpow2.f32 %v881_v54  ;;  %v885_v15 = vmul.f32 1.442695, %v871_v16  ;;  %v1292_v28 = vadd.f32 %v1291_v38, %v1290_v4  ;;  %v820_v45 = vmul.f32 0.43638277, %v2277_v62  ;;  %v2975_v38 = vld [vmem:[#allocation27_spill] sm:$0xff] }
 0x125   :  { %v1255_v27 = vadd.f32 %v1254_v3, %v1253_v22  ;;  %1616 = vpow2.f32 %v883_v17  ;;  %v887_v60 = vmul.f32 1.442695, %v872_v5  ;;  %1389 = vst [vmem:[#allocation10 + $0xc] sm:$0x1] %v1370_v57  ;;  %v827_v13 = vadd.f32 %v819_v1, %v811_v58  ;;  %v2978_v5 = vld [vmem:[#allocation33_spill] sm:$0xff] }
 0x126   :  { %1618 = vpow2.f32 %v885_v15  ;;  %v1293_v44 = vrot.slane %v1292_v28, 1  ;;  %v828_v37 = vadd.f32 %v820_v45, %v812_v24  ;;  %v2639_v55 = vadd.f32 0.5, %v825_v19 }
 0x127   :  { %v1256_v33 = vrot.slane %v1255_v27, 2  ;;  %1620 = vpow2.f32 %v887_v60  ;;  %v2641_v14 = vadd.f32 0.5, %v826_v8  ;;  %v2643_v10 = vadd.f32 0.5, %v827_v13 }
 0x128   :  { %v902_v12 = vmul.f32 7.787, %v2580_v53  ;;  %v1294_v62 = vadd.f32 %v1293_v44, %v1292_v28  ;;  %v2646_v41 = vadd.f32 0.5, %v828_v37  ;;  %v921_v21 = vmax.f32 %v2639_v55, 0.008856 }
 0x129   :  { %v1257_v58 = vadd.f32 %v1256_v33, %v1255_v27  ;;  %v903_v63 = vmul.f32 7.787, %v2583_v29  ;;  %v922_v24 = vmax.f32 %v2641_v14, 0.008856  ;;  %v923_v6 = vmax.f32 %v2643_v10, 0.008856 }
 0x12a   :  { %v904_v52 = vmul.f32 7.787, %v2585_v35  ;;  %v1371_v47 = vadd.f32 %v1352_v7, %v1294_v62  ;;  %v924_v0 = vmax.f32 %v2646_v41, 0.008856  ;;  %1622 = vlog2.f32 %v921_v21  ;;  %v2979_v27 = vld [vmem:[#allocation29_spill] sm:$0xff] }
 0x12b   :  { %v1258_v59 = vrot.slane %v1257_v58, 1  ;;  %vm893_vm4 = vcmp.gt.f32.partialorder %v2578_v20, 0.008856  ;;  %vm894_vm5 = vcmp.gt.f32.partialorder %v2580_v53, 0.008856  ;;  %1624 = vlog2.f32 %v922_v24  ;;  %v2980_v20 = vld [vmem:[#allocation34_spill] sm:$0xff] }
 0x12c   :  { %vm895_vm6 = vcmp.gt.f32.partialorder %v2583_v29, 0.008856  ;;  %vm896_vm7 = vcmp.gt.f32.partialorder %v2585_v35, 0.008856  ;;  %v909_v23 = vadd.f32 0.137931, %v2607_v39  ;;  %1626 = vlog2.f32 %v923_v6 }
 0x12d   :  { %1390 = vst [vmem:[#allocation10 + $0xd] sm:$0x1] %v1371_v47  ;;  %v1259_v40 = vadd.f32 %v1258_v59, %v1257_v58  ;;  %v910_v50 = vadd.f32 0.137931, %v902_v12  ;;  %v911_v4 = vadd.f32 0.137931, %v903_v63  ;;  %1628 = vlog2.f32 %v924_v0 }
 0x12e   :  { %v912_v51 = vadd.f32 0.137931, %v904_v52  ;;  %v2660_v2 = vmul.f32 7.787, %v2639_v55  ;;  %v797_v18 = vmul.f32 0.0088789575, %v2318_v30  ;;  %v1330_v16 = vadd.f32 %v2428_v34, %v2358_v11 }
 0x12f   :  { %v1368_v1 = vadd.f32 %v1349_v36, %v1259_v40  ;;  %v798_v19 = vmul.f32 0.0088789575, %v2320_v26  ;;  %v799_v22 = vmul.f32 0.0088789575, %v2322_v61  ;;  %v800_v43 = vmul.f32 0.0088789575, %v2327_v42 }
 0x130   :  { %v805_v39 = vmul.f32 0.05473826, %v2334_v48  ;;  %v806_v46 = vmul.f32 0.05473826, %v2961_v9  ;;  %v807_v56 = vmul.f32 0.05473826, %v2962_v31  ;;  %v1331_v35 = vadd.f32 %v2434_v25, %v1330_v16 }
 0x131   :  { %v1615_v54 = vpop.eup %1614  ;;  %1387 = vst [vmem:[#allocation10 + $0xa] sm:$0x1] %v1368_v1  ;;  %v808_v30 = vmul.f32 0.05473826, %v2963_v49  ;;  %v821_v8 = vmul.f32 0.43638277, %v2975_v38 }
 0x132   :  { %v2976_v26 = vld [vmem:[#allocation28_spill] sm:$0xff]  ;;  %v2977_v61 = vld [vmem:[#allocation35_spill] sm:$0xff]  ;;  %v1617_v17 = vpop.eup %1616  ;;  %v917_v48 = vsel %vm893_vm4, %v1615_v54, %v909_v23  ;;  %v813_v9 = vadd.f32 %v805_v39, %v797_v18  ;;  %v814_v31 = vadd.f32 %v806_v46, %v798_v19  ;;  %v815_v57 = vadd.f32 %v807_v56, %v799_v22 }
 0x133   :  { %v822_v3 = vmul.f32 0.43638277, %v2976_v26  ;;  %v1323_v42 = vadd.f32 %v2978_v5, %v2977_v61  ;;  %v1619_v15 = vpop.eup %1618  ;;  %v918_v28 = vsel %vm894_vm5, %v1617_v17, %v910_v50  ;;  %v1247_v49 = vmul.f32 %v2358_v11, %v917_v48 }
 0x134   :  { %v816_v45 = vadd.f32 %v808_v30, %v800_v43  ;;  %v823_v60 = vmul.f32 0.43638277, %v2979_v27  ;;  %v1621_v13 = vpop.eup %1620  ;;  %v919_v44 = vsel %vm895_vm6, %v1619_v15, %v911_v4  ;;  %v1248_v37 = vmul.f32 %v2428_v34, %v918_v28 }
 0x135   :  { %v824_v33 = vmul.f32 0.43638277, %v2980_v20  ;;  %v829_v7 = vadd.f32 %v821_v8, %v813_v9  ;;  %v920_v12 = vsel %vm896_vm7, %v1621_v13, %v912_v51  ;;  %v1249_v53 = vmul.f32 %v2434_v25, %v919_v44 }
 0x136   :  { %v830_v62 = vadd.f32 %v822_v3, %v814_v31  ;;  %v831_v21 = vadd.f32 %v823_v60, %v815_v57  ;;  %v1250_v58 = vmul.f32 %v2451_v32, %v920_v12  ;;  %v1260_v63 = vadd.f32 %v1248_v37, %v1247_v49  ;;  %v1350_v37 = vld [vmem:[#allocation10 + $0xb] sm:$0x1] }
 0x137   :  { %v832_v24 = vadd.f32 %v824_v33, %v816_v45  ;;  %v2690_v6 = vadd.f32 0.5, %v829_v7  ;;  %v1623_v29 = vpop.eup %1622  ;;  %v978_v36 = vmul.f32 7.787, %v2641_v14  ;;  %v1324_v50 = vrot.slane %v1323_v42, 4 }
 0x138   :  { %v2693_v52 = vadd.f32 0.5, %v830_v62  ;;  %v2695_v47 = vadd.f32 0.5, %v831_v21  ;;  %v1625_v0 = vpop.eup %1624  ;;  %v1261_v59 = vadd.f32 %v1260_v63, %v1249_v53  ;;  %v930_v23 = vmul.f32 0.6931472, %v1623_v29 }
 0x139   :  { %v925_v40 = vmax.f32 %v2690_v6, 0.008856  ;;  %v1627_v4 = vpop.eup %1626  ;;  %v932_v51 = vmul.f32 0.6931472, %v1625_v0  ;;  %v2701_v46 = vadd.f32 0.5, %v832_v24  ;;  %v1332_v54 = vadd.f32 %v2451_v32, %v1331_v35  ;;  %v1654_v35 = vld [vmem:[#allocation2] sm:$0xff] }
 0x13a   :  { %v926_v18 = vmax.f32 %v2693_v52, 0.008856  ;;  %v927_v1 = vmax.f32 %v2695_v47, 0.008856  ;;  %v1629_v19 = vpop.eup %1628  ;;  %v1262_v22 = vadd.f32 %v1261_v59, %v1250_v58  ;;  %v934_v43 = vmul.f32 0.6931472, %v1627_v4 }
 0x13b   :  { %v945_v39 = vmul.f32 0.33333334, %v930_v23  ;;  %v936_v56 = vmul.f32 0.6931472, %v1629_v19  ;;  %v946_v16 = vmul.f32 0.33333334, %v932_v51  ;;  %1630 = vlog2.f32 %v925_v40 }
 0x13c   :  { %v1263_v30 = vrot.slane %v1262_v22, 4  ;;  %v947_v38 = vmul.f32 0.33333334, %v934_v43  ;;  %1632 = vlog2.f32 %v926_v18  ;;  %v1325_v61 = vadd.f32 %v1324_v50, %v1323_v42  ;;  %v1655_v0 = vld [vmem:[#allocation5] sm:$0xff]  ;;  %v1656_v43 = vld [vmem:[#allocation2 + $0x8] sm:$0xff] }
 0x13d   :  { %v953_v8 = vmul.f32 1.442695, %v945_v39  ;;  %v948_v26 = vmul.f32 0.33333334, %v936_v56  ;;  %v955_v3 = vmul.f32 1.442695, %v946_v16  ;;  %1634 = vlog2.f32 %v927_v1 }
 0x13e   :  { %v1264_v17 = vadd.f32 %v1263_v30, %v1262_v22  ;;  %v957_v48 = vmul.f32 1.442695, %v947_v38  ;;  %v928_v9 = vmax.f32 %v2701_v46, 0.008856  ;;  %v1333_v57 = vrot.slane %v1332_v54, 4  ;;  %v1657_v39 = vld [vmem:[#allocation5 + $0x8] sm:$0xff] }
 0x13f   :  { %1636 = vpow2.f32 %v953_v8  ;;  %v959_v31 = vmul.f32 1.442695, %v948_v26  ;;  %v979_v28 = vmul.f32 7.787, %v2643_v10  ;;  %v980_v49 = vmul.f32 7.787, %v2646_v41 }
 0x140   :  { %1638 = vpow2.f32 %v955_v3  ;;  %v1265_v15 = vrot.slane %v1264_v17, 2  ;;  %vm969_vm8 = vcmp.gt.f32.partialorder %v2639_v55, 0.008856  ;;  %v2709_v45 = vadd.f32 0.137931, %v2660_v2  ;;  %v2981_v2 = vld [vmem:[#allocation30_spill] sm:$0xff] }
 0x141   :  { %1640 = vpow2.f32 %v957_v48  ;;  %v2711_v42 = vadd.f32 0.137931, %v978_v36  ;;  %v1326_v27 = vrot.slane %v1325_v61, 2  ;;  %vm970_vm9 = vcmp.gt.f32.partialorder %v2641_v14, 0.008856  ;;  %v1658_v8 = vld [vmem:[#allocation2 + $0x10] sm:$0xff] }
 0x142   :  { %1642 = vpow2.f32 %v959_v31  ;;  %v1266_v60 = vadd.f32 %v1265_v15, %v1264_v17  ;;  %v981_v13 = vmul.f32 7.787, %v2690_v6  ;;  %v982_v44 = vmul.f32 7.787, %v2693_v52  ;;  %v1355_v36 = vld [vmem:[#allocation10 + $0x10] sm:$0x1] }
 0x143   :  { %1644 = vlog2.f32 %v928_v9  ;;  %vm971_vm10 = vcmp.gt.f32.partialorder %v2643_v10, 0.008856  ;;  %v983_v20 = vmul.f32 7.787, %v2695_v47  ;;  %v1327_v33 = vadd.f32 %v1326_v27, %v1325_v61  ;;  %v1659_v26 = vld [vmem:[#allocation5 + $0x10] sm:$0xff]  ;;  %v1660_v48 = vld [vmem:[#allocation2 + $0x18] sm:$0xff] }
 0x144   :  { %v1334_v7 = vadd.f32 %v1333_v57, %v1332_v54  ;;  %vm184_vm11 = vcmp.gt.f32.partialorder %v2981_v2, 0.0  ;;  %v1267_v12 = vrot.slane %v1266_v60, 1  ;;  %vm972_vm12 = vcmp.gt.f32.partialorder %v2646_v41, 0.008856  ;;  %v1661_v9 = vld [vmem:[#allocation5 + $0x18] sm:$0xff]  ;;  %v1662_v57 = vld [vmem:[#allocation2 + $0x60] sm:$0xff] }
 0x145   :  { %v2720_v53 = vadd.f32 0.137931, %v979_v28  ;;  %v984_v62 = vmul.f32 7.787, %v2701_v46  ;;  %v2723_v21 = vadd.f32 0.137931, %v980_v49  ;;  %v2728_v59 = vsub.f32 %v1654_v35, %v1655_v0 }
 0x146   :  { %v1328_v58 = vrot.slane %v1327_v33, 1  ;;  %v1335_v63 = vrot.slane %v1334_v7, 2  ;;  %vm188_vm13 = vcmp.gt.f32.partialorder %v2358_v11, 0.0  ;;  %v1268_v24 = vadd.f32 %v1267_v12, %v1266_v60  ;;  %v1663_v15 = vld [vmem:[#allocation5 + $0x60] sm:$0xff]  ;;  %v1664_v49 = vld [vmem:[#allocation2 + $0x68] sm:$0xff]  ;;  %v1667_v2 = vld [vmem:[#allocation5 + $0x70] sm:$0xff] }
 0x147   :  { %v2726_v29 = vadd.f32 0.137931, %v981_v13  ;;  %vm192_vm14 = vmor %vm184_vm11, %vm188_vm13  ;;  %v2730_v23 = vadd.f32 0.137931, %v982_v44  ;;  %v2732_v40 = vadd.f32 0.137931, %v983_v20  ;;  %v2739_v56 = vsub.f32 %v1656_v43, %v1657_v39 }
 0x148   :  { %v1329_v50 = vadd.f32 %v1328_v58, %v1327_v33  ;;  %v1336_v4 = vadd.f32 %v1335_v63, %v1334_v7  ;;  %v1631_v51 = vpop.eup %1630  ;;  %v1369_v18 = vadd.f32 %v1350_v37, %v1268_v24  ;;  %v2734_v1 = vadd.f32 0.137931, %v984_v62  ;;  %v1665_v27 = vld [vmem:[#allocation5 + $0x68] sm:$0xff]  ;;  %v1356_v33 = vld [vmem:[#allocation10 + $0x11] sm:$0x1]  ;;  %v1668_v24 = vld [vmem:[#allocation2 + $0x78] sm:$0xff] }
 0x149   :  { %v1819_v19 = vmov 1.0   ;;  %v1633_v16 = vpop.eup %1632  ;;  %v938_v54 = vmul.f32 0.6931472, %v1631_v51  ;;  %v2741_v3 = vsub.f32 %v1658_v8, %v1659_v26  ;;  %v2743_v31 = vsub.f32 %v1660_v48, %v1661_v9  ;;  %v1666_v7 = vld [vmem:[#allocation2 + $0x70] sm:$0xff]  ;;  %v1670_v0 = vld [vmem:[#allocation2 + $0x20] sm:$0xff]  ;;  %v1672_v10 = vld [vmem:[#allocation2 + $0x28] sm:$0xff] }
 0x14a   :  { %v2737_v22 = vsel %vm192_vm14, 0.0, %v1819_v19  ;;  %v1374_v30 = vadd.f32 %v1355_v36, %v1329_v50  ;;  %v1337_v38 = vrot.slane %v1336_v4, 1  ;;  %v1635_v61 = vpop.eup %1634  ;;  %1388 = vst [vmem:[#allocation10 + $0xb] sm:$0x1] %v1369_v18  ;;  %v940_v17 = vmul.f32 0.6931472, %v1633_v16 }
 0x14b   :  { %v2745_v28 = vsub.f32 %v1662_v57, %v1663_v15  ;;  %v2747_v60 = vsub.f32 %v1664_v49, %v1665_v27  ;;  %v942_v44 = vmul.f32 0.6931472, %v1635_v61  ;;  %v949_v37 = vmul.f32 0.33333334, %v938_v54  ;;  %v1669_v36 = vld [vmem:[#allocation5 + $0x78] sm:$0xff]  ;;  %v1671_v50 = vld [vmem:[#allocation5 + $0x20] sm:$0xff] }
 0x14c   :  { %v1637_v13 = vpop.eup %1636  ;;  %1393 = vst [vmem:[#allocation10 + $0x10] sm:$0x1] %v1374_v30  ;;  %v1338_v20 = vadd.f32 %v1337_v38, %v1336_v4  ;;  %v2749_v12 = vsub.f32 %v1666_v7, %v1667_v2  ;;  %v950_v63 = vmul.f32 0.33333334, %v940_v17  ;;  %v2754_v35 = vsub.f32 %v1668_v24, %v1669_v36  ;;  %v1674_v57 = vld [vmem:[#allocation2 + $0x30] sm:$0xff]  ;;  %v1676_v41 = vld [vmem:[#allocation2 + $0x38] sm:$0xff] }
 0x14d   :  { %v1639_v62 = vpop.eup %1638  ;;  %v993_v58 = vsel %vm969_vm8, %v1637_v13, %v2709_v45  ;;  %v2756_v51 = vsub.f32 %v1670_v0, %v1671_v50  ;;  %v951_v39 = vmul.f32 0.33333334, %v942_v44  ;;  %v961_v16 = vmul.f32 1.442695, %v949_v37  ;;  %v1675_v15 = vld [vmem:[#allocation5 + $0x30] sm:$0xff]  ;;  %v1678_v37 = vld [vmem:[#allocation2 + $0x80] sm:$0xff] }
 0x14e   :  { %v1641_v4 = vpop.eup %1640  ;;  %v994_v18 = vsel %vm970_vm9, %v1639_v62, %v2711_v42  ;;  %v1295_v43 = vmul.f32 %v2358_v11, %v993_v58  ;;  %v963_v30 = vmul.f32 1.442695, %v950_v63  ;;  %v1375_v38 = vadd.f32 %v1356_v33, %v1338_v20  ;;  %v1679_v20 = vld [vmem:[#allocation5 + $0x80] sm:$0xff]  ;;  %v1680_v7 = vld [vmem:[#allocation2 + $0x88] sm:$0xff]  ;;  %v1682_v58 = vld [vmem:[#allocation2 + $0x90] sm:$0xff] }
 0x14f   :  { %v1643_v55 = vpop.eup %1642  ;;  %v995_v45 = vsel %vm971_vm10, %v1641_v4, %v2720_v53  ;;  %v1296_v54 = vmul.f32 %v2428_v34, %v994_v18  ;;  %1646 = vpow2.f32 %v961_v16  ;;  %v965_v42 = vmul.f32 1.442695, %v951_v39  ;;  %v1673_v53 = vld [vmem:[#allocation5 + $0x28] sm:$0xff]  ;;  %v1683_v63 = vld [vmem:[#allocation5 + $0x90] sm:$0xff]  ;;  %v1684_v36 = vld [vmem:[#allocation2 + $0x98] sm:$0xff] }
 0x150   :  { %v1645_v8 = vpop.eup %1644  ;;  %v996_v26 = vsel %vm972_vm12, %v1643_v55, %v2723_v21  ;;  %v1297_v14 = vmul.f32 %v2434_v25, %v995_v45  ;;  %1648 = vpow2.f32 %v963_v30  ;;  %1394 = vst [vmem:[#allocation10 + $0x11] sm:$0x1] %v1375_v38  ;;  %v2771_v9 = vsub.f32 %v1672_v10, %v1673_v53  ;;  %v1677_v21 = vld [vmem:[#allocation5 + $0x38] sm:$0xff]  ;;  %v1681_v2 = vld [vmem:[#allocation5 + $0x88] sm:$0xff]  ;;  %v1686_v4 = vld [vmem:[#allocation2 + $0x40] sm:$0xff] }
 0x151   :  { %v1298_v61 = vmul.f32 %v2451_v32, %v996_v26  ;;  %v1303_v17 = vadd.f32 %v1296_v54, %v1295_v43  ;;  %v944_v48 = vmul.f32 0.6931472, %v1645_v8  ;;  %1650 = vpow2.f32 %v965_v42  ;;  %v1685_v0 = vld [vmem:[#allocation5 + $0x98] sm:$0xff]  ;;  %v1687_v18 = vld [vmem:[#allocation5 + $0x40] sm:$0xff]  ;;  %v1688_v39 = vld [vmem:[#allocation2 + $0x48] sm:$0xff] }
 0x152   :  { %v2773_v49 = vsub.f32 %v1674_v57, %v1675_v15  ;;  %v2775_v27 = vsub.f32 %v1676_v41, %v1677_v21  ;;  %vm973_vm15 = vcmp.gt.f32.partialorder %v2690_v6, 0.008856  ;;  %v212_v33 = vsub.f32 %v1678_v37, %v1679_v20  ;;  %v1689_v16 = vld [vmem:[#allocation5 + $0x48] sm:$0xff]  ;;  %v1690_v30 = vld [vmem:[#allocation2 + $0x50] sm:$0xff]  ;;  %v1692_v26 = vld [vmem:[#allocation2 + $0x58] sm:$0xff] }
 0x153   :  { %v1304_v13 = vadd.f32 %v1303_v17, %v1297_v14  ;;  %v952_v44 = vmul.f32 0.33333334, %v944_v48  ;;  %v213_v62 = vsub.f32 %v1680_v7, %v1681_v2  ;;  %vm974_vm0 = vcmp.gt.f32.partialorder %v2693_v52, 0.008856  ;;  %v1691_v38 = vld [vmem:[#allocation5 + $0x50] sm:$0xff]  ;;  %v1693_v14 = vld [vmem:[#allocation5 + $0x58] sm:$0xff] }
 0x154   :  { %v214_v24 = vsub.f32 %v1682_v58, %v1683_v63  ;;  %v215_v50 = vsub.f32 %v1684_v36, %v1685_v0  ;;  %v2779_v43 = vsub.f32 %v1686_v4, %v1687_v18  ;;  %v217_v55 = vsub.f32 %v1688_v39, %v1689_v16  ;;  %v2982_v17 = vld [vmem:[#allocation31_spill] sm:$0xff]  ;;  %v1694_v48 = vld [vmem:[#allocation2 + $0xa0] sm:$0xff]  ;;  %v1696_v57 = vld [vmem:[#allocation2 + $0xa8] sm:$0xff] }
 0x155   :  { %v1305_v45 = vadd.f32 %v1304_v13, %v1298_v61  ;;  %v967_v54 = vmul.f32 1.442695, %v952_v44  ;;  %vm975_vm1 = vcmp.gt.f32.partialorder %v2695_v47, 0.008856  ;;  %v218_v8 = vsub.f32 %v1690_v30, %v1691_v38  ;;  %v1695_v10 = vld [vmem:[#allocation5 + $0xa0] sm:$0xff]  ;;  %v1697_v15 = vld [vmem:[#allocation5 + $0xa8] sm:$0xff] }
 0x156   :  { %v219_v42 = vsub.f32 %v1692_v26, %v1693_v14  ;;  %vm185_vm2 = vcmp.gt.f32.partialorder %v2982_v17, 0.0  ;;  %vm189_vm3 = vcmp.gt.f32.partialorder %v2428_v34, 0.0  ;;  %v220_v53 = vsub.f32 %v1694_v48, %v1695_v10  ;;  %v1698_v61 = vld [vmem:[#allocation2 + $0xb0] sm:$0xff]  ;;  %v1700_v44 = vld [vmem:[#allocation2 + $0xb8] sm:$0xff] }
 0x157   :  { %v221_v41 = vsub.f32 %v1696_v57, %v1697_v15  ;;  %v1699_v21 = vld [vmem:[#allocation5 + $0xb0] sm:$0xff]  ;;  %v1701_v37 = vld [vmem:[#allocation5 + $0xb8] sm:$0xff]  ;;  %v1306_v7 = vrot.slane %v1305_v45, 4  ;;  %1652 = vpow2.f32 %v967_v54  ;;  %vm190_vm5 = vcmp.gt.f32.partialorder %v2434_v25, 0.0  ;;  %vm2831_vm9 = vmor %vm185_vm2, %vm189_vm3 }
 0x158   :  { %v222_v13 = vsub.f32 %v1698_v61, %v1699_v21  ;;  %v223_v20 = vsub.f32 %v1700_v44, %v1701_v37  ;;  %v2983_v2 = vld [vmem:[#allocation32_spill] sm:$0xff]  ;;  %v224_v58 = vmul.f32 %v2728_v59, %v2728_v59  ;;  %v225_v63 = vmul.f32 %v2739_v56, %v2739_v56  ;;  %v1353_v37 = vld [vmem:[#allocation10 + $0xe] sm:$0x1] }
 0x159   :  { %vm186_vm4 = vcmp.gt.f32.partialorder %v2983_v2, 0.0  ;;  %v226_v36 = vmul.f32 %v2741_v3, %v2741_v3  ;;  %v227_v0 = vmul.f32 %v2743_v31, %v2743_v31  ;;  %v228_v4 = vmul.f32 %v2745_v28, %v2745_v28 }
 0x15a   :  { %v229_v18 = vmul.f32 %v2747_v60, %v2747_v60  ;;  %v1307_v39 = vadd.f32 %v1306_v7, %v1305_v45  ;;  %vm187_vm6 = vcmp.gt.f32.partialorder %v2978_v5, 0.0  ;;  %vm191_vm7 = vcmp.gt.f32.partialorder %v2451_v32, 0.0  ;;  %vm2839_vm10 = vmor %vm186_vm4, %vm190_vm5 }
 0x15b   :  { %v230_v59 = vmul.f32 %v2749_v12, %v2749_v12  ;;  %v231_v56 = vmul.f32 %v2754_v35, %v2754_v35  ;;  %v232_v3 = vmul.f32 %v2756_v51, %v2756_v51  ;;  %vm976_vm8 = vcmp.gt.f32.partialorder %v2701_v46, 0.008856  ;;  %vm195_vm11 = vmor %vm187_vm6, %vm191_vm7 }
 0x15c   :  { %v233_v31 = vmul.f32 %v2771_v9, %v2771_v9  ;;  %v234_v28 = vmul.f32 %v2773_v49, %v2773_v49  ;;  %v235_v60 = vmul.f32 %v2775_v27, %v2775_v27  ;;  %v236_v16 = vmul.f32 %v212_v33, %v212_v33  ;;  %v1647_v14 = vpop.eup %1646 }
 0x15d   :  { %v1308_v45 = vrot.slane %v1307_v39, 2  ;;  %v237_v12 = vmul.f32 %v213_v62, %v213_v62  ;;  %v238_v54 = vmul.f32 %v214_v24, %v214_v24  ;;  %v239_v30 = vmul.f32 %v215_v50, %v215_v50  ;;  %v1649_v15 = vpop.eup %1648 }
 0x15e   :  { %v240_v35 = vadd.f32 %v232_v3, %v224_v58  ;;  %v241_v38 = vadd.f32 %v233_v31, %v225_v63  ;;  %v242_v26 = vadd.f32 %v234_v28, %v226_v36  ;;  %v243_v51 = vadd.f32 %v235_v60, %v227_v0  ;;  %v1651_v24 = vpop.eup %1650 }
 0x15f   :  { %v1309_v48 = vadd.f32 %v1308_v45, %v1307_v39  ;;  %v244_v10 = vadd.f32 %v236_v16, %v228_v4  ;;  %v245_v57 = vadd.f32 %v237_v12, %v229_v18  ;;  %v246_v9 = vadd.f32 %v238_v54, %v230_v59 }
 0x160   :  { %v997_v49 = vsel %vm973_vm15, %v1647_v14, %v2726_v29  ;;  %v247_v27 = vadd.f32 %v239_v30, %v231_v56  ;;  %v248_v33 = vmul.f32 %v2779_v43, %v2779_v43  ;;  %v249_v62 = vmul.f32 %v217_v55, %v217_v55 }
 0x161   :  { %v1310_v50 = vrot.slane %v1309_v48, 1  ;;  %v998_v61 = vsel %vm974_vm0, %v1649_v15, %v2730_v23  ;;  %v1299_v21 = vmul.f32 %v2358_v11, %v997_v49  ;;  %v250_v44 = vmul.f32 %v218_v8, %v218_v8  ;;  %v1357_v15 = vld [vmem:[#allocation10 + $0x12] sm:$0x1] }
 0x162   :  { %v999_v6 = vsel %vm975_vm1, %v1651_v24, %v2732_v40  ;;  %v1300_v29 = vmul.f32 %v2428_v34, %v998_v61  ;;  %v251_v7 = vmul.f32 %v219_v42, %v219_v42  ;;  %v252_v58 = vmul.f32 %v220_v53, %v220_v53 }
 0x163   :  { %v1311_v43 = vadd.f32 %v1310_v50, %v1309_v48  ;;  %v1301_v55 = vmul.f32 %v2434_v25, %v999_v6  ;;  %v253_v11 = vmul.f32 %v221_v41, %v221_v41  ;;  %v254_v23 = vmul.f32 %v222_v13, %v222_v13  ;;  %v1354_v48 = vld [vmem:[#allocation10 + $0xf] sm:$0x1] }
 0x164   :  { %v1312_v8 = vadd.f32 %v1300_v29, %v1299_v21  ;;  %v255_v40 = vmul.f32 %v223_v20, %v223_v20  ;;  %v256_v42 = vadd.f32 %v248_v33, %v240_v35  ;;  %v257_v34 = vadd.f32 %v249_v62, %v241_v38  ;;  %v1653_v0 = vpop.eup %1652 }
 0x165   :  { %v1372_v53 = vadd.f32 %v1353_v37, %v1311_v43  ;;  %v258_v17 = vadd.f32 %v250_v44, %v242_v26  ;;  %v259_v63 = vadd.f32 %v251_v7, %v243_v51  ;;  %v260_v36 = vadd.f32 %v252_v58, %v244_v10 }
 0x166   :  { %v1313_v4 = vadd.f32 %v1312_v8, %v1301_v55  ;;  %v261_v25 = vadd.f32 %v253_v11, %v245_v57  ;;  %v262_v41 = vadd.f32 %v254_v23, %v246_v9  ;;  %v263_v13 = vadd.f32 %v255_v40, %v247_v27 }
 0x167   :  { %1391 = vst [vmem:[#allocation10 + $0xe] sm:$0x1] %v1372_v53  ;;  %v1000_v20 = vsel %vm976_vm8, %v1653_v0, %v2734_v1  ;;  %v197_v2 = vsel %vm2831_vm9, 0.0, %v1819_v19  ;;  %v198_v18 = vsel %vm2839_vm10, 0.0, %v1819_v19  ;;  %v264_v39 = vadd.f32 %v260_v36, %v256_v42 }
 0x168   :  { %v1302_v5 = vmul.f32 %v2451_v32, %v1000_v20  ;;  %v265_v59 = vadd.f32 %v261_v25, %v257_v34  ;;  %v266_v56 = vadd.f32 %v262_v41, %v258_v17  ;;  %v267_v3 = vadd.f32 %v263_v13, %v259_v63 }
 0x169   :  { %v199_v31 = vsel %vm195_vm11, 0.0, %v1819_v19  ;;  %v268_v28 = vmul.f32 %v264_v39, %v2737_v22 }
 0x16a   :  { %v1314_v46 = vadd.f32 %v1313_v4, %v1302_v5  ;;  %v269_v1 = vmul.f32 %v265_v59, %v197_v2  ;;  %v270_v60 = vmul.f32 %v266_v56, %v198_v18  ;;  %v271_v45 = vmul.f32 %v267_v3, %v199_v31 }
 0x16c   :  { %v1315_v16 = vrot.slane %v1314_v46, 4  ;;  %v272_v12 = vadd.f32 %v269_v1, %v268_v28 }
 0x16e   :  { %v1316_v54 = vadd.f32 %v1315_v16, %v1314_v46  ;;  %v273_v30 = vadd.f32 %v272_v12, %v270_v60 }
 0x170   :  { %v1317_v35 = vrot.slane %v1316_v54, 2  ;;  %v274_v38 = vadd.f32 %v273_v30, %v271_v45 }
 0x172   :  { %v1318_v26 = vadd.f32 %v1317_v35, %v1316_v54  ;;  %v275_v51 = vrot.slane %v274_v38, 4 }
 0x174   :  { %v1319_v32 = vrot.slane %v1318_v26, 1  ;;  %v276_v14 = vadd.f32 %v275_v51, %v274_v38 }
 0x176   :  { %v1320_v10 = vadd.f32 %v1319_v32, %v1318_v26  ;;  %v277_v57 = vrot.slane %v276_v14, 2 }
 0x178   :  { %v1373_v19 = vadd.f32 %v1354_v48, %v1320_v10  ;;  %v278_v9 = vadd.f32 %v277_v57, %v276_v14 }
 0x17a   :  { %1392 = vst [vmem:[#allocation10 + $0xf] sm:$0x1] %v1373_v19  ;;  %v279_v22 = vrot.slane %v278_v9, 1 }
 0x17c   :  { %v280_v49 = vadd.f32 %v279_v22, %v278_v9 }
 0x17e   :  { %v1376_v27 = vadd.f32 %v1357_v15, %v280_v49 }
 0x180   :  { %1395 = vst [vmem:[#allocation10 + $0x12] sm:$0x1] %v1376_v27 }
 0x181   :  { %1793 = shalt.err (!%p1790_p10)
}
 0x182   :  { %s1821_s13 = smov 16   ;;  %s1822_s14 = smov 1  }
 0x183   :  { %1407 = dma.vmem_to_hbm [thread:$0]  %s1402_s3, 304, %s2866_s4, [#allocation4], %s1821_s13, %s1821_s13, %s1822_s14  }
 0x184   :  { %1808 = dma.done.wait [#allocation4], 304  }
 0x185   :  { %1809 = vsyncadd [#allocation4], 4294966992 }
 0x186   :  { %1411 = vsyncpa [#allocation3], 1 }
 0x187   :  { %1412 = vsyncpa [#allocation6], 1 }
 0x188   :  { %1413 = vsyncpa [#allocation9], 1 }
 0x189   :  { %1414 = vsyncpa [#allocation4], 1 }

</bundles_post_ra>
